<compile_context>
chip_gen: v6e
topology: v6e:2x2x1
jax: 0.10.0
libtpu: 0.0.40
codegen_flags: <defaults>
</compile_context>

<pallas_src>
import jax
import jax.numpy as jnp
from jax.experimental import pallas as pl
from jax.experimental.pallas import tpu as pltpu

MAT_DIFF_LOSS_SCALE = 0.001


def _loss_kernel(pred_ref, target_ref, trans_ref, out_ref):
    pred = pred_ref[...].astype(jnp.float32)        # [Bt, C] log-probs (f32 math)
    target = target_ref[...]                        # [Bt, 1] int32
    trans = trans_ref[...]                          # [Bt, K, K] native dtype -> MXU

    Bt, C = pred.shape
    K = trans.shape[-1]

    # ---- NLL term: classes stay on the lane axis -> one select + one lane reduce.
    class_ids = jax.lax.broadcasted_iota(jnp.int32, (Bt, C), 1)
    picked = jnp.sum(jnp.where(class_ids == target, pred, 0.0),
                     axis=1, keepdims=True)                          # [Bt, 1]
    # TODO(synk): no ignore_index / class-weight handling (matches this model's
    # get_loss usage; diverges from F.nll_loss defaults if targets contain -100).

    # ---- Regularizer term: || T T^T - I ||_F per batch row.
    # Gram on the MXU at native dtype with an f32 accumulator (no up-front cast).
    gram = jnp.einsum('bij,bkj->bik', trans, trans,
                      preferred_element_type=jnp.float32)            # [Bt, K, K]

    # Subtract the identity on the diagonal (well-conditioned), no eye tensor,
    # no reshapes: two chained single-axis reduces on the native (K,K) layout.
    row_ids = jax.lax.broadcasted_iota(jnp.int32, (Bt, K, K), 1)
    col_ids = jax.lax.broadcasted_iota(jnp.int32, (Bt, K, K), 2)
    diff = gram - (row_ids == col_ids).astype(jnp.float32)           # [Bt, K, K]
    sq = diff * diff
    frob_sq = jnp.sum(jnp.sum(sq, axis=2, keepdims=True),            # lane reduce    [Bt,K,1]
                      axis=1, keepdims=True)                         # sublane reduce [Bt,1,1]
    mat_term = jnp.sqrt(frob_sq)[..., 0]                             # [Bt, 1]

    # Independent per-row partial contribution; mean over B happens in the wrapper.
    out_ref[...] = -picked + jnp.float32(MAT_DIFF_LOSS_SCALE) * mat_term


def _pick_batch_tile(B, bytes_per_row, budget_bytes=24 << 20):
    """Whole batch in one resident block when the double-buffered working set
    fits the budget; otherwise the largest power-of-two multiple of 8 dividing B."""
    if B % 8 != 0 or 2 * B * bytes_per_row <= budget_bytes:
        return B
    bt = 8
    while B % (2 * bt) == 0 and 2 * (2 * bt) * bytes_per_row <= budget_bytes:
        bt *= 2
    return bt


def pointnet_cls_loss(pred, target, trans_feat, *, batch_tile=None):
    """pred: [B, C] log-probs, target: [B] int, trans_feat: [B, K, K].

    Inputs are consumed at their incoming dtype (bf16 pred / trans_feat accepted;
    trans_feat feeds the MXU natively, pred is promoted to f32 in-kernel)."""
    B, C = pred.shape
    K = trans_feat.shape[-1]
    target2d = target.astype(jnp.int32).reshape(B, 1)

    itemsize = lambda x: jnp.dtype(x.dtype).itemsize
    bytes_per_row = K * K * itemsize(trans_feat) + C * itemsize(pred) + 4 + 4

    bt = batch_tile if batch_tile is not None else _pick_batch_tile(B, bytes_per_row)
    assert B % bt == 0 and (bt % 8 == 0 or bt == B), (
        f"batch tile {bt} must divide batch {B} and be a multiple of 8 (or the full batch)")
    grid = (B // bt,)

    # Raise the scoped-VMEM limit only when the working set would exceed the
    # smallest scoped default (v5e: 16 MiB); 32 MiB is safe on all generations.
    working_set = 2 * bt * bytes_per_row
    vmem_limit = (32 << 20) if working_set > (12 << 20) else None

    cost = pl.CostEstimate(
        flops=int(2 * B * K * K * K + 6 * B * K * K + 3 * B * C),
        transcendentals=int(B),
        bytes_accessed=int(pred.size * itemsize(pred)
                           + trans_feat.size * itemsize(trans_feat)
                           + 2 * B * 4),
    )

    partial = pl.pallas_call(
        _loss_kernel,
        out_shape=jax.ShapeDtypeStruct((B, 1), jnp.float32),
        grid=grid,
        in_specs=[
            pl.BlockSpec((bt, C), lambda i: (i, 0)),
            pl.BlockSpec((bt, 1), lambda i: (i, 0)),
            pl.BlockSpec((bt, K, K), lambda i: (i, 0, 0)),
        ],
        out_specs=pl.BlockSpec((bt, 1), lambda i: (i, 0)),
        compiler_params=pltpu.CompilerParams(
            dimension_semantics=("parallel",),
            vmem_limit_bytes=vmem_limit,
        ),
        cost_estimate=cost,
    )(pred, target2d, trans_feat)

    # Tiny final reduction (B f32s) + mean in the wrapper keeps the grid axis
    # legally "parallel" so both v7x TensorCores can take tiles.
    return jnp.mean(partial)


def _reference(pred, target, trans_feat):
    # pure-JAX reference for correctness check
    B = pred.shape[0]
    K = trans_feat.shape[-1]
    nll = -jnp.mean(pred[jnp.arange(B), target])
    tt = jnp.einsum('bij,bkj->bik', trans_feat, trans_feat)
    diff = tt - jnp.eye(K, dtype=jnp.float32)[None]
    reg = jnp.mean(jnp.sqrt(jnp.sum(diff * diff, axis=(1, 2))))
    return nll + reg * MAT_DIFF_LOSS_SCALE


if __name__ == "__main__":
    B, C, K = 32, 16, 8   # small shapes: batch=32, num_classes=16, feat-transform 8x8
    key = jax.random.PRNGKey(0)
    k1, k2, k3 = jax.random.split(key, 3)

    logits = jax.random.normal(k1, (B, C), dtype=jnp.float32)
    pred = jax.nn.log_softmax(logits, axis=-1)                  # log-probs, like model output
    target = jax.random.randint(k2, (B,), 0, C, dtype=jnp.int32)
    trans_feat = jax.random.normal(k3, (B, K, K), dtype=jnp.float32)

    ref = _reference(pred, target, trans_feat)

    # auto tile: whole batch resident, grid=(1,)
    loss = pointnet_cls_loss(pred, target, trans_feat)
    jax.block_until_ready(loss)
    assert jnp.allclose(loss, ref, rtol=1e-5, atol=1e-5), (loss, ref)

    # explicit small tile -> 4 independent ("parallel") grid steps
    loss_tiled = pointnet_cls_loss(pred, target, trans_feat, batch_tile=8)
    jax.block_until_ready(loss_tiled)
    assert jnp.allclose(loss_tiled, ref, rtol=1e-5, atol=1e-5), (loss_tiled, ref)

    print("KERNEL_OK")
</pallas_src>

<mosaic_0001>
module attributes {stable_mosaic.version = 11 : i64} {
  func.func @_loss_kernel(%arg0: i32, %arg1: memref<32x16xf32, #tpu.memory_space<vmem>>, %arg2: memref<32x1xi32, #tpu.memory_space<vmem>>, %arg3: memref<32x8x8xf32, #tpu.memory_space<vmem>>, %arg4: memref<32x1xf32, #tpu.memory_space<vmem>>) attributes {dimension_semantics = [#tpu.dimension_semantics<parallel>], iteration_bounds = array<i64: 1>, scalar_prefetch = 0 : i64, scratch_operands = 0 : i64, tpu.core_type = #tpu.core_type<tc>, window_params = [{transform_indices = @transform_0, window_bounds = array<i64: 32, 16>}, {transform_indices = @transform_1, window_bounds = array<i64: 32, 1>}, {transform_indices = @transform_2, window_bounds = array<i64: 32, 8, 8>}, {transform_indices = @transform_3, window_bounds = array<i64: 32, 1>}]} {
    %c0 = arith.constant 0 : index
    %c0_0 = arith.constant 0 : index
    %0 = vector.load %arg1[%c0, %c0_0] : memref<32x16xf32, #tpu.memory_space<vmem>>, vector<32x16xf32>
    %c0_1 = arith.constant 0 : index
    %c0_2 = arith.constant 0 : index
    %1 = vector.load %arg2[%c0_1, %c0_2] : memref<32x1xi32, #tpu.memory_space<vmem>>, vector<32x1xi32>
    %c0_3 = arith.constant 0 : index
    %c0_4 = arith.constant 0 : index
    %c0_5 = arith.constant 0 : index
    %2 = vector.load %arg3[%c0_3, %c0_4, %c0_5] : memref<32x8x8xf32, #tpu.memory_space<vmem>>, vector<32x8x8xf32>
    %3 = tpu.iota {dimensions = array<i32: 1>} : vector<32x16xi32>
    %4 = vector.broadcast %1 : vector<32x1xi32> to vector<32x16xi32>
    %5 = arith.cmpi eq, %3, %4 : vector<32x16xi32>
    %cst = arith.constant 0.000000e+00 : f32
    %6 = vector.broadcast %cst : f32 to vector<32x16xf32>
    %7 = arith.select %5, %0, %6 : vector<32x16xi1>, vector<32x16xf32>
    %cst_6 = arith.constant dense<0.000000e+00> : vector<32xf32>
    %8 = vector.multi_reduction <add>, %7, %cst_6 [1] : vector<32x16xf32> to vector<32xf32>
    %9 = vector.shape_cast %8 : vector<32xf32> to vector<32x1xf32>
    "tpu.trace_start"() <{level = 10 : i32, message = "bij,bkj->bik"}> : () -> ()
    %cst_7 = arith.constant dense<0.000000e+00> : vector<32x8x8xf32>
    %10 = tpu.matmul %2, %2, %cst_7 {dimension_numbers = #tpu.dot_dimension_numbers<[2], [2], [1], [1], [0, 0, 0, 1, 1, 1], [0], [0]>} : vector<32x8x8xf32>, vector<32x8x8xf32>, vector<32x8x8xf32> -> vector<32x8x8xf32>
    "tpu.trace_stop"() : () -> ()
    %11 = tpu.iota {dimensions = array<i32: 1>} : vector<32x8x8xi32>
    %12 = tpu.iota {dimensions = array<i32: 2>} : vector<32x8x8xi32>
    %13 = arith.cmpi eq, %11, %12 : vector<32x8x8xi32>
    %14 = arith.extui %13 : vector<32x8x8xi1> to vector<32x8x8xi32>
    %15 = arith.sitofp %14 : vector<32x8x8xi32> to vector<32x8x8xf32>
    %16 = arith.subf %10, %15 : vector<32x8x8xf32>
    %17 = arith.mulf %16, %16 : vector<32x8x8xf32>
    %cst_8 = arith.constant dense<0.000000e+00> : vector<32x8xf32>
    %18 = vector.multi_reduction <add>, %17, %cst_8 [2] : vector<32x8x8xf32> to vector<32x8xf32>
    %19 = vector.shape_cast %18 : vector<32x8xf32> to vector<32x8x1xf32>
    %cst_9 = arith.constant dense<0.000000e+00> : vector<32x1xf32>
    %20 = vector.multi_reduction <add>, %19, %cst_9 [1] : vector<32x8x1xf32> to vector<32x1xf32>
    %21 = vector.shape_cast %20 : vector<32x1xf32> to vector<32x1x1xf32>
    %22 = math.sqrt %21 : vector<32x1x1xf32>
    %23 = vector.shape_cast %22 : vector<32x1x1xf32> to vector<32x1xf32>
    %cst_10 = arith.constant 0.000000e+00 : f32
    %24 = vector.broadcast %cst_10 : f32 to vector<32x1xf32>
    %25 = arith.subf %24, %9 : vector<32x1xf32>
    %cst_11 = arith.constant 1.000000e-03 : f32
    %26 = vector.broadcast %cst_11 : f32 to vector<32x1xf32>
    %27 = arith.mulf %26, %23 : vector<32x1xf32>
    %28 = arith.addf %25, %27 : vector<32x1xf32>
    %c0_12 = arith.constant 0 : index
    %c0_13 = arith.constant 0 : index
    %29 = vector.load %arg4[%c0_12, %c0_13] : memref<32x1xf32, #tpu.memory_space<vmem>>, vector<32x1xf32>
    tpu.vector_store %arg4[%c0_12, %c0_13], %28 {strides = array<i32>} : memref<32x1xf32, #tpu.memory_space<vmem>>, vector<32x1xf32>,
    return
  }
  func.func @transform_0(%arg0: i32) -> (i32, i32) {
    %c0_i32 = arith.constant 0 : i32
    %c0_i32_0 = arith.constant 0 : i32
    return %arg0, %c0_i32 : i32, i32
  }
  func.func @transform_1(%arg0: i32) -> (i32, i32) {
    %c0_i32 = arith.constant 0 : i32
    %c0_i32_0 = arith.constant 0 : i32
    return %arg0, %c0_i32 : i32, i32
  }
  func.func @transform_2(%arg0: i32) -> (i32, i32, i32) {
    %c0_i32 = arith.constant 0 : i32
    %c0_i32_0 = arith.constant 0 : i32
    %c0_i32_1 = arith.constant 0 : i32
    return %arg0, %c0_i32, %c0_i32_0 : i32, i32, i32
  }
  func.func @transform_3(%arg0: i32) -> (i32, i32) {
    %c0_i32 = arith.constant 0 : i32
    %c0_i32_0 = arith.constant 0 : i32
    return %arg0, %c0_i32 : i32, i32
  }
}

</mosaic_0001>

<bundles_post_ra>
// kernel: tpu_custom_call.1
= control target key start
LH: loop header
LB: loop body
LE: loop exit
PB: predicated region body
PF: predicated region fallthrough
CT: control target
= control target key end

     0   :  { %vm89_vm0 = vcmask 64512   ;;  %v3485_v0 = vmov 0.0   ;;  %vm3486_vm1 = vmmov 0   ;;  %v3487_v7 = vmov 0   ;;  %s4320_s2 = inlined_call_operand.vmem [shape: f32[32,8,8], index: 2, kind: input, shape index: {}]   ;;  %s4321_s1 = inlined_call_operand.vmem [shape: s32[32,1], index: 1, kind: input, shape index: {}]   ;;  %s4322_s0 = inlined_call_operand.vmem [shape: f32[32,16], index: 0, kind: input, shape index: {}]   ;;  %s4323_s3 = inlined_call_operand.vmem [shape: f32[32,1], index: 3, kind: output, shape index: {}]  }
   0x1   :  { %3256 = vmatprep.subr.mxu0 %v3485_v0  ;;  %3261 = vmatprep.subr.mxu1 %v3485_v0  ;;  %v22_v1 = vld [vmem:[%s4320_s2] sm:$0xff]  ;;  %v23_v2 = vld [vmem:[%s4320_s2 + $0x8] sm:$0xff]  ;;  %v24_v3 = vld [vmem:[%s4320_s2 + $0x10] sm:$0xff]  ;;  %v54_v38 = vlaneseq  ;;  %vm76_vm5 = vcmask 130048  }
   0x2   :  { %3257 = vmatpush3.xpose.msk.msra.mxu0 %vm89_vm0, %v22_v1  ;;  %3262 = vmatpush3.xpose.msk.msra.mxu1 %vm89_vm0, %v23_v2  ;;  %v25_v4 = vld [vmem:[%s4320_s2 + $0x18] sm:$0xff]  ;;  %v26_v5 = vld [vmem:[%s4320_s2 + $0x20] sm:$0xff]  ;;  %v27_v6 = vld [vmem:[%s4320_s2 + $0x28] sm:$0xff] }
   0x3   :  { %3258 = vmatprep.mubr.msk.f32.mxu0 %vm3486_vm1, %v3485_v0  ;;  %3263 = vmatprep.mubr.msk.f32.mxu1 %vm3486_vm1, %v3485_v0  ;;  %v28_v8 = vld [vmem:[%s4320_s2 + $0x30] sm:$0xff]  ;;  %v29_v9 = vld [vmem:[%s4320_s2 + $0x38] sm:$0xff]  ;;  %v30_v10 = vld [vmem:[%s4320_s2 + $0x40] sm:$0xff]  ;;  %v3778_v39 = vand.u32 127, %v54_v38  ;;  %v2427_v40 = vshrl.u32 %v54_v38, 7 }
   0x4   :  { %3266 = vmatprep.subr.mxu0 %v3485_v0  ;;  %3271 = vmatprep.subr.mxu1 %v3485_v0  ;;  %v31_v11 = vld [vmem:[%s4320_s2 + $0x48] sm:$0xff]  ;;  %v32_v12 = vld [vmem:[%s4320_s2 + $0x50] sm:$0xff]  ;;  %v33_v13 = vld [vmem:[%s4320_s2 + $0x58] sm:$0xff] }
   0x5   :  { %3259 = vmatmul.mubr.msk.f32.vlgmr.msra.gmra.mxu0 %vm89_vm0, %v22_v1  ;;  %3264 = vmatmul.mubr.msk.f32.vlgmr.msra.gmra.mxu1 %vm89_vm0, %v23_v2  ;;  %v34_v14 = vld [vmem:[%s4320_s2 + $0x60] sm:$0xff]  ;;  %v35_v15 = vld [vmem:[%s4320_s2 + $0x68] sm:$0xff]  ;;  %v36_v16 = vld [vmem:[%s4320_s2 + $0x70] sm:$0xff]  ;;  %vm2428_vm2 = vcmp.eq.s32.totalorder %v2427_v40, %v3778_v39 }
   0x6   :  { %3267 = vmatpush3.xpose.msk.msra.mxu0 %vm89_vm0, %v24_v3  ;;  %3268 = vmatprep.mubr.msk.f32.mxu0 %vm3486_vm1, %v3485_v0  ;;  %v37_v17 = vld [vmem:[%s4320_s2 + $0x78] sm:$0xff]  ;;  %v38_v18 = vld [vmem:[%s4320_s2 + $0x80] sm:$0xff]  ;;  %v39_v19 = vld [vmem:[%s4320_s2 + $0x88] sm:$0xff]  ;;  %v3782_v41 = vsel %vm2428_vm2, 1.0, %v3485_v0 }
   0x7   :  { %3272 = vmatpush3.xpose.msk.msra.mxu1 %vm89_vm0, %v25_v4  ;;  %3276 = vmatprep.subr.mxu0 %v3485_v0  ;;  %v40_v20 = vld [vmem:[%s4320_s2 + $0x90] sm:$0xff]  ;;  %v41_v21 = vld [vmem:[%s4320_s2 + $0x98] sm:$0xff]  ;;  %v42_v22 = vld [vmem:[%s4320_s2 + $0xa0] sm:$0xff] }
   0x8   :  { %3273 = vmatprep.mubr.msk.f32.mxu1 %vm3486_vm1, %v3485_v0  ;;  %3281 = vmatprep.subr.mxu1 %v3485_v0  ;;  %v43_v23 = vld [vmem:[%s4320_s2 + $0xa8] sm:$0xff]  ;;  %v44_v24 = vld [vmem:[%s4320_s2 + $0xb0] sm:$0xff]  ;;  %v45_v25 = vld [vmem:[%s4320_s2 + $0xb8] sm:$0xff] }
   0x9   :  { %3269 = vmatmul.mubr.msk.f32.vlgmr.msra.gmra.mxu0 %vm89_vm0, %v24_v3  ;;  %3419 = vset.pattern.permute.xlu0 %v3487_v7  ;;  %v46_v26 = vld [vmem:[%s4320_s2 + $0xc0] sm:$0xff]  ;;  %v47_v27 = vld [vmem:[%s4320_s2 + $0xc8] sm:$0xff]  ;;  %v48_v28 = vld [vmem:[%s4320_s2 + $0xd0] sm:$0xff] }
   0xa   :  { %3277 = vmatpush3.xpose.msk.msra.mxu0 %vm89_vm0, %v26_v5  ;;  %3274 = vmatmul.mubr.msk.f32.vlgmr.msra.gmra.mxu1 %vm89_vm0, %v25_v4  ;;  %v49_v29 = vld [vmem:[%s4320_s2 + $0xd8] sm:$0xff]  ;;  %v50_v30 = vld [vmem:[%s4320_s2 + $0xe0] sm:$0xff]  ;;  %v51_v31 = vld [vmem:[%s4320_s2 + $0xe8] sm:$0xff] }
   0xb   :  { %3278 = vmatprep.mubr.msk.f32.mxu0 %vm3486_vm1, %v3485_v0  ;;  %3282 = vmatpush3.xpose.msk.msra.mxu1 %vm89_vm0, %v27_v6  ;;  %v52_v32 = vld [vmem:[%s4320_s2 + $0xf0] sm:$0xff]  ;;  %v53_v33 = vld [vmem:[%s4320_s2 + $0xf8] sm:$0xff]  ;;  %v18_v34 = vld [vmem:[%s4321_s1] sm:$0xff] }
   0xc   :  { %3286 = vmatprep.subr.mxu0 %v3485_v0  ;;  %3283 = vmatprep.mubr.msk.f32.mxu1 %vm3486_vm1, %v3485_v0  ;;  %v20_v35 = vld [vmem:[%s4321_s1 + $0x10] sm:$0xff]  ;;  %v19_v36 = vld [vmem:[%s4321_s1 + $0x8] sm:$0xff]  ;;  %v21_v37 = vld [vmem:[%s4321_s1 + $0x18] sm:$0xff] }
   0xd   :  { %3279 = vmatmul.mubr.msk.f32.vlgmr.msra.gmra.mxu0 %vm89_vm0, %v26_v5  ;;  %3291 = vmatprep.subr.mxu1 %v3485_v0 }
   0xe   :  { %3287 = vmatpush3.xpose.msk.msra.mxu0 %vm89_vm0, %v28_v8  ;;  %3284 = vmatmul.mubr.msk.f32.vlgmr.msra.gmra.mxu1 %vm89_vm0, %v27_v6 }
   0xf   :  { %3288 = vmatprep.mubr.msk.f32.mxu0 %vm3486_vm1, %v3485_v0  ;;  %3292 = vmatpush3.xpose.msk.msra.mxu1 %vm89_vm0, %v29_v9 }
  0x10   :  { %3296 = vmatprep.subr.mxu0 %v3485_v0  ;;  %3293 = vmatprep.mubr.msk.f32.mxu1 %vm3486_vm1, %v3485_v0 }
  0x11   :  { %3289 = vmatmul.mubr.msk.f32.vlgmr.msra.gmra.mxu0 %vm89_vm0, %v28_v8  ;;  %3301 = vmatprep.subr.mxu1 %v3485_v0 }
  0x12   :  { %3297 = vmatpush3.xpose.msk.msra.mxu0 %vm89_vm0, %v30_v10  ;;  %3294 = vmatmul.mubr.msk.f32.vlgmr.msra.gmra.mxu1 %vm89_vm0, %v29_v9 }
  0x13   :  { %3298 = vmatprep.mubr.msk.f32.mxu0 %vm3486_vm1, %v3485_v0  ;;  %3302 = vmatpush3.xpose.msk.msra.mxu1 %vm89_vm0, %v31_v11 }
  0x14   :  { %3306 = vmatprep.subr.mxu0 %v3485_v0  ;;  %3303 = vmatprep.mubr.msk.f32.mxu1 %vm3486_vm1, %v3485_v0 }
  0x15   :  { %3299 = vmatmul.mubr.msk.f32.vlgmr.msra.gmra.mxu0 %vm89_vm0, %v30_v10  ;;  %3311 = vmatprep.subr.mxu1 %v3485_v0 }
  0x16   :  { %3307 = vmatpush3.xpose.msk.msra.mxu0 %vm89_vm0, %v32_v12  ;;  %3304 = vmatmul.mubr.msk.f32.vlgmr.msra.gmra.mxu1 %vm89_vm0, %v31_v11 }
  0x17   :  { %3308 = vmatprep.mubr.msk.f32.mxu0 %vm3486_vm1, %v3485_v0  ;;  %3312 = vmatpush3.xpose.msk.msra.mxu1 %vm89_vm0, %v33_v13 }
  0x18   :  { %3316 = vmatprep.subr.mxu0 %v3485_v0  ;;  %3313 = vmatprep.mubr.msk.f32.mxu1 %vm3486_vm1, %v3485_v0 }
  0x19   :  { %3309 = vmatmul.mubr.msk.f32.vlgmr.msra.gmra.mxu0 %vm89_vm0, %v32_v12  ;;  %3321 = vmatprep.subr.mxu1 %v3485_v0 }
  0x1a   :  { %3317 = vmatpush3.xpose.msk.msra.mxu0 %vm89_vm0, %v34_v14  ;;  %3314 = vmatmul.mubr.msk.f32.vlgmr.msra.gmra.mxu1 %vm89_vm0, %v33_v13 }
  0x1b   :  { %3318 = vmatprep.mubr.msk.f32.mxu0 %vm3486_vm1, %v3485_v0  ;;  %3322 = vmatpush3.xpose.msk.msra.mxu1 %vm89_vm0, %v35_v15 }
  0x1c   :  { %3326 = vmatprep.subr.mxu0 %v3485_v0  ;;  %3323 = vmatprep.mubr.msk.f32.mxu1 %vm3486_vm1, %v3485_v0 }
  0x1d   :  { %3319 = vmatmul.mubr.msk.f32.vlgmr.msra.gmra.mxu0 %vm89_vm0, %v34_v14  ;;  %3331 = vmatprep.subr.mxu1 %v3485_v0 }
  0x1e   :  { %3327 = vmatpush3.xpose.msk.msra.mxu0 %vm89_vm0, %v36_v16  ;;  %3324 = vmatmul.mubr.msk.f32.vlgmr.msra.gmra.mxu1 %vm89_vm0, %v35_v15 }
  0x1f   :  { %3328 = vmatprep.mubr.msk.f32.mxu0 %vm3486_vm1, %v3485_v0  ;;  %3332 = vmatpush3.xpose.msk.msra.mxu1 %vm89_vm0, %v37_v17 }
  0x20   :  { %3336 = vmatprep.subr.mxu0 %v3485_v0  ;;  %3333 = vmatprep.mubr.msk.f32.mxu1 %vm3486_vm1, %v3485_v0 }
  0x21   :  { %3329 = vmatmul.mubr.msk.f32.vlgmr.msra.gmra.mxu0 %vm89_vm0, %v36_v16  ;;  %3341 = vmatprep.subr.mxu1 %v3485_v0 }
  0x22   :  { %3337 = vmatpush3.xpose.msk.msra.mxu0 %vm89_vm0, %v38_v18  ;;  %3334 = vmatmul.mubr.msk.f32.vlgmr.msra.gmra.mxu1 %vm89_vm0, %v37_v17 }
  0x23   :  { %3338 = vmatprep.mubr.msk.f32.mxu0 %vm3486_vm1, %v3485_v0  ;;  %3342 = vmatpush3.xpose.msk.msra.mxu1 %vm89_vm0, %v39_v19 }
  0x24   :  { %3346 = vmatprep.subr.mxu0 %v3485_v0  ;;  %3343 = vmatprep.mubr.msk.f32.mxu1 %vm3486_vm1, %v3485_v0 }
  0x25   :  { %3339 = vmatmul.mubr.msk.f32.vlgmr.msra.gmra.mxu0 %vm89_vm0, %v38_v18  ;;  %3351 = vmatprep.subr.mxu1 %v3485_v0 }
  0x26   :  { %3347 = vmatpush3.xpose.msk.msra.mxu0 %vm89_vm0, %v40_v20  ;;  %3344 = vmatmul.mubr.msk.f32.vlgmr.msra.gmra.mxu1 %vm89_vm0, %v39_v19 }
  0x27   :  { %3348 = vmatprep.mubr.msk.f32.mxu0 %vm3486_vm1, %v3485_v0  ;;  %3352 = vmatpush3.xpose.msk.msra.mxu1 %vm89_vm0, %v41_v21 }
  0x28   :  { %3353 = vmatprep.mubr.msk.f32.mxu1 %vm3486_vm1, %v3485_v0  ;;  %3356 = vmatprep.subr.mxu0 %v3485_v0 }
  0x29   :  { %3349 = vmatmul.mubr.msk.f32.vlgmr.msra.gmra.mxu0 %vm89_vm0, %v40_v20  ;;  %3361 = vmatprep.subr.mxu1 %v3485_v0 }
  0x2a   :  { %3354 = vmatmul.mubr.msk.f32.vlgmr.msra.gmra.mxu1 %vm89_vm0, %v41_v21  ;;  %3357 = vmatpush3.xpose.msk.msra.mxu0 %vm89_vm0, %v42_v22 }
  0x2b   :  { %3362 = vmatpush3.xpose.msk.msra.mxu1 %vm89_vm0, %v43_v23  ;;  %3358 = vmatprep.mubr.msk.f32.mxu0 %vm3486_vm1, %v3485_v0 }
  0x2c   :  { %3363 = vmatprep.mubr.msk.f32.mxu1 %vm3486_vm1, %v3485_v0  ;;  %3366 = vmatprep.subr.mxu0 %v3485_v0 }
  0x2d   :  { %3359 = vmatmul.mubr.msk.f32.vlgmr.msra.gmra.mxu0 %vm89_vm0, %v42_v22  ;;  %3371 = vmatprep.subr.mxu1 %v3485_v0 }
  0x2e   :  { %3364 = vmatmul.mubr.msk.f32.vlgmr.msra.gmra.mxu1 %vm89_vm0, %v43_v23  ;;  %3367 = vmatpush3.xpose.msk.msra.mxu0 %vm89_vm0, %v44_v24 }
  0x2f   :  { %3372 = vmatpush3.xpose.msk.msra.mxu1 %vm89_vm0, %v45_v25  ;;  %3368 = vmatprep.mubr.msk.f32.mxu0 %vm3486_vm1, %v3485_v0 }
  0x30   :  { %3373 = vmatprep.mubr.msk.f32.mxu1 %vm3486_vm1, %v3485_v0  ;;  %3376 = vmatprep.subr.mxu0 %v3485_v0 }
  0x31   :  { %3369 = vmatmul.mubr.msk.f32.vlgmr.msra.gmra.mxu0 %vm89_vm0, %v44_v24  ;;  %3381 = vmatprep.subr.mxu1 %v3485_v0 }
  0x32   :  { %3374 = vmatmul.mubr.msk.f32.vlgmr.msra.gmra.mxu1 %vm89_vm0, %v45_v25  ;;  %3377 = vmatpush3.xpose.msk.msra.mxu0 %vm89_vm0, %v46_v26 }
  0x33   :  { %3382 = vmatpush3.xpose.msk.msra.mxu1 %vm89_vm0, %v47_v27  ;;  %3378 = vmatprep.mubr.msk.f32.mxu0 %vm3486_vm1, %v3485_v0 }
  0x34   :  { %3383 = vmatprep.mubr.msk.f32.mxu1 %vm3486_vm1, %v3485_v0  ;;  %3386 = vmatprep.subr.mxu0 %v3485_v0 }
  0x35   :  { %3379 = vmatmul.mubr.msk.f32.vlgmr.msra.gmra.mxu0 %vm89_vm0, %v46_v26  ;;  %3391 = vmatprep.subr.mxu1 %v3485_v0 }
  0x36   :  { %3384 = vmatmul.mubr.msk.f32.vlgmr.msra.gmra.mxu1 %vm89_vm0, %v47_v27  ;;  %3387 = vmatpush3.xpose.msk.msra.mxu0 %vm89_vm0, %v48_v28 }
  0x37   :  { %3388 = vmatprep.mubr.msk.f32.mxu0 %vm3486_vm1, %v3485_v0  ;;  %3392 = vmatpush3.xpose.msk.msra.mxu1 %vm89_vm0, %v49_v29 }
  0x38   :  { %3393 = vmatprep.mubr.msk.f32.mxu1 %vm3486_vm1, %v3485_v0  ;;  %3396 = vmatprep.subr.mxu0 %v3485_v0 }
  0x39   :  { %3389 = vmatmul.mubr.msk.f32.vlgmr.msra.gmra.mxu0 %vm89_vm0, %v48_v28  ;;  %3401 = vmatprep.subr.mxu1 %v3485_v0 }
  0x3a   :  { %3394 = vmatmul.mubr.msk.f32.vlgmr.msra.gmra.mxu1 %vm89_vm0, %v49_v29  ;;  %3397 = vmatpush3.xpose.msk.msra.mxu0 %vm89_vm0, %v50_v30 }
  0x3b   :  { %3398 = vmatprep.mubr.msk.f32.mxu0 %vm3486_vm1, %v3485_v0  ;;  %3402 = vmatpush3.xpose.msk.msra.mxu1 %vm89_vm0, %v51_v31 }
  0x3c   :  { %3403 = vmatprep.mubr.msk.f32.mxu1 %vm3486_vm1, %v3485_v0  ;;  %3406 = vmatprep.subr.mxu0 %v3485_v0 }
  0x3d   :  { %3399 = vmatmul.mubr.msk.f32.vlgmr.msra.gmra.mxu0 %vm89_vm0, %v50_v30  ;;  %3411 = vmatprep.subr.mxu1 %v3485_v0 }
  0x3e   :  { %3404 = vmatmul.mubr.msk.f32.vlgmr.msra.gmra.mxu1 %vm89_vm0, %v51_v31  ;;  %3407 = vmatpush3.xpose.msk.msra.mxu0 %vm89_vm0, %v52_v32 }
  0x3f   :  { %3408 = vmatprep.mubr.msk.f32.mxu0 %vm3486_vm1, %v3485_v0  ;;  %3412 = vmatpush3.xpose.msk.msra.mxu1 %vm89_vm0, %v53_v33 }
  0x40   :  { %3413 = vmatprep.mubr.msk.f32.mxu1 %vm3486_vm1, %v3485_v0  ;;  %57 = vperm.xlu0 %3419, %v18_v34  }
  0x41   :  { %3409 = vmatmul.mubr.msk.f32.vlgmr.msra.gmra.mxu0 %vm89_vm0, %v52_v32  ;;  %3420 = vset.pattern.permute.xlu1 %v3487_v7 }
  0x42   :  { %3414 = vmatmul.mubr.msk.f32.vlgmr.msra.gmra.mxu1 %vm89_vm0, %v53_v33  ;;  %63 = vperm.xlu1 %3420, %v20_v35  }
  0x44   :  { %60 = vperm.xlu0 %3419, %v19_v36  }
  0x46   :  { %66 = vperm.xlu1 %3420, %v21_v37  }
  0xc5   :  { %v159_v42 = vpop.f32.mrf.mxu0  ;;  %v232_v43 = vpop.f32.mrf.mxu1 }
  0xc6   :  { %v2431_v44 = vsub.f32 %v159_v42, %v3782_v41  ;;  %v2432_v45 = vsub.f32 %v232_v43, %v3782_v41 }
  0xc7   :  { %v3260_v46 = vpop.f32.mrf.mxu0  ;;  %v3265_v47 = vpop.f32.mrf.mxu1 }
  0xc8   :  { %v2463_v48 = vmul.f32 %v2431_v44, %v2431_v44  ;;  %v2464_v49 = vmul.f32 %v2432_v45, %v2432_v45 }
  0xc9   :  { %v305_v50 = vpop.f32.mrf.mxu0 }
  0xca   :  { %v2433_v51 = vsub.f32 %v305_v50, %v3782_v41  ;;  %v2498_v52 = vsel %vm89_vm0, %v2464_v49, 0.0  ;;  %v2495_v53 = vsel %vm89_vm0, %v2463_v48, 0.0  ;;  %v378_v54 = vpop.f32.mrf.mxu1 }
  0xcb   :  { %v3270_v55 = vpop.f32.mrf.mxu0  ;;  %2499 = vadd.xlane.f32.xlu1 %v2498_v52  ;;  %2496 = vadd.xlane.f32.xlu0 %v2495_v53  ;;  %v2434_v56 = vsub.f32 %v378_v54, %v3782_v41 }
  0xcc   :  { %v2465_v57 = vmul.f32 %v2433_v51, %v2433_v51  ;;  %v3275_v58 = vpop.f32.mrf.mxu1 }
  0xcd   :  { %v2466_v59 = vmul.f32 %v2434_v56, %v2434_v56  ;;  %v451_v60 = vpop.f32.mrf.mxu0 }
  0xce   :  { %v2435_v61 = vsub.f32 %v451_v60, %v3782_v41  ;;  %v2501_v62 = vsel %vm89_vm0, %v2465_v57, 0.0  ;;  %v524_v63 = vpop.f32.mrf.mxu1 }
  0xcf   :  { %v3280_v0 = vpop.f32.mrf.mxu0  ;;  %2502 = vadd.xlane.f32.xlu1 %v2501_v62  ;;  %v2504_v2 = vsel %vm89_vm0, %v2466_v59, 0.0  ;;  %v2436_v5 = vsub.f32 %v524_v63, %v3782_v41 }
  0xd0   :  { %v3285_v1 = vpop.f32.mrf.mxu1  ;;  %v2467_v4 = vmul.f32 %v2435_v61, %v2435_v61 }
  0xd1   :  { %v597_v3 = vpop.f32.mrf.mxu0  ;;  %v2468_v10 = vmul.f32 %v2436_v5, %v2436_v5 }
  0xd2   :  { %v3794_v6 = vpop.f32.mrf.mxu1  ;;  %v2437_v11 = vsub.f32 %v597_v3, %v3782_v41  ;;  %v2507_v13 = vsel %vm89_vm0, %v2467_v4, 0.0 }
  0xd3   :  { %v3290_v7 = vpop.f32.mrf.mxu0  ;;  %2505 = vadd.xlane.f32.xlu1 %v2504_v2  ;;  %v2510_v23 = vsel %vm89_vm0, %v2468_v10, 0.0 }
  0xd4   :  { %v3295_v8 = vpop.f32.mrf.mxu1  ;;  %v2469_v21 = vmul.f32 %v2437_v11, %v2437_v11 }
  0xd5   :  { %v743_v9 = vpop.f32.mrf.mxu0 }
  0xd6   :  { %v2439_v12 = vsub.f32 %v743_v9, %v3782_v41  ;;  %v816_v14 = vpop.f32.mrf.mxu1  ;;  %v2513_v32 = vsel %vm89_vm0, %v2469_v21, 0.0 }
  0xd7   :  { %v3300_v15 = vpop.f32.mrf.mxu0  ;;  %2508 = vadd.xlane.f32.xlu1 %v2507_v13  ;;  %v2440_v16 = vsub.f32 %v816_v14, %v3782_v41 }
  0xd8   :  { %v2471_v17 = vmul.f32 %v2439_v12, %v2439_v12  ;;  %v3305_v18 = vpop.f32.mrf.mxu1 }
  0xd9   :  { %v2472_v19 = vmul.f32 %v2440_v16, %v2440_v16  ;;  %v889_v20 = vpop.f32.mrf.mxu0 }
  0xda   :  { %v2441_v22 = vsub.f32 %v889_v20, %v3782_v41  ;;  %v2519_v24 = vsel %vm89_vm0, %v2471_v17, 0.0  ;;  %v962_v25 = vpop.f32.mrf.mxu1 }
  0xdb   :  { %v3310_v26 = vpop.f32.mrf.mxu0  ;;  %2511 = vadd.xlane.f32.xlu1 %v2510_v23  ;;  %2520 = vadd.xlane.f32.xlu0 %v2519_v24  ;;  %v2522_v29 = vsel %vm89_vm0, %v2472_v19, 0.0  ;;  %v2442_v31 = vsub.f32 %v962_v25, %v3782_v41 }
  0xdc   :  { %v2473_v27 = vmul.f32 %v2441_v22, %v2441_v22  ;;  %v3315_v28 = vpop.f32.mrf.mxu1 }
  0xdd   :  { %v1035_v30 = vpop.f32.mrf.mxu0  ;;  %v2474_v38 = vmul.f32 %v2442_v31, %v2442_v31 }
  0xde   :  { %v1108_v33 = vpop.f32.mrf.mxu1  ;;  %v2525_v36 = vsel %vm89_vm0, %v2473_v27, 0.0  ;;  %v2443_v40 = vsub.f32 %v1035_v30, %v3782_v41 }
  0xdf   :  { %v3320_v34 = vpop.f32.mrf.mxu0  ;;  %2514 = vadd.xlane.f32.xlu1 %v2513_v32  ;;  %2523 = vadd.xlane.f32.xlu0 %v2522_v29  ;;  %v2444_v45 = vsub.f32 %v1108_v33, %v3782_v41  ;;  %v2528_v49 = vsel %vm89_vm0, %v2474_v38, 0.0 }
  0xe0   :  { %v3325_v35 = vpop.f32.mrf.mxu1  ;;  %v2475_v47 = vmul.f32 %v2443_v40, %v2443_v40 }
  0xe1   :  { %v1181_v37 = vpop.f32.mrf.mxu0  ;;  %v2476_v54 = vmul.f32 %v2444_v45, %v2444_v45 }
  0xe2   :  { %v1254_v42 = vpop.f32.mrf.mxu1  ;;  %v2445_v56 = vsub.f32 %v1181_v37, %v3782_v41  ;;  %v2531_v59 = vsel %vm89_vm0, %v2475_v47, 0.0 }
  0xe3   :  { %v3330_v43 = vpop.f32.mrf.mxu0  ;;  %2526 = vadd.xlane.f32.xlu0 %v2525_v36  ;;  %v2534_v2 = vsel %vm89_vm0, %v2476_v54, 0.0  ;;  %v2446_v14 = vsub.f32 %v1254_v42, %v3782_v41 }
  0xe4   :  { %v3335_v44 = vpop.f32.mrf.mxu1  ;;  %v2477_v4 = vmul.f32 %v2445_v56, %v2445_v56 }
  0xe5   :  { %v1327_v46 = vpop.f32.mrf.mxu0  ;;  %v2478_v23 = vmul.f32 %v2446_v14, %v2446_v14 }
  0xe6   :  { %v2447_v48 = vsub.f32 %v1327_v46, %v3782_v41  ;;  %v1400_v50 = vpop.f32.mrf.mxu1  ;;  %v2537_v18 = vsel %vm89_vm0, %v2477_v4, 0.0 }
  0xe7   :  { %v3340_v51 = vpop.f32.mrf.mxu0  ;;  %2529 = vadd.xlane.f32.xlu0 %v2528_v49  ;;  %v2448_v5 = vsub.f32 %v1400_v50, %v3782_v41  ;;  %v2540_v33 = vsel %vm89_vm0, %v2478_v23, 0.0  ;;  %v15_v23 = vld [vmem:[%s4322_s0 + $0x8] sm:$0xff] }
  0xe8   :  { %v2479_v52 = vmul.f32 %v2447_v48, %v2447_v48  ;;  %v3345_v53 = vpop.f32.mrf.mxu1  ;;  %v2438_v48 = vsub.f32 %v3794_v6, %v3782_v41 }
  0xe9   :  { %v1473_v55 = vpop.f32.mrf.mxu0  ;;  %v2480_v16 = vmul.f32 %v2448_v5, %v2448_v5  ;;  %v14_v5 = vld [vmem:[%s4322_s0] sm:$0xff] }
  0xea   :  { %v2449_v57 = vsub.f32 %v1473_v55, %v3782_v41  ;;  %v2543_v58 = vsel %vm89_vm0, %v2479_v52, 0.0  ;;  %v1546_v60 = vpop.f32.mrf.mxu1 }
  0xeb   :  { %2544 = vadd.xlane.f32.xlu1 %v2543_v58  ;;  %2532 = vadd.xlane.f32.xlu0 %v2531_v59  ;;  %v2450_v61 = vsub.f32 %v1546_v60, %v3782_v41  ;;  %v3350_v62 = vpop.f32.mrf.mxu0  ;;  %v2546_v27 = vsel %vm89_vm0, %v2480_v16, 0.0  ;;  %v2470_v58 = vmul.f32 %v2438_v48, %v2438_v48 }
  0xec   :  { %v2481_v63 = vmul.f32 %v2449_v57, %v2449_v57  ;;  %v3355_v0 = vpop.f32.mrf.mxu1 }
  0xed   :  { %v2482_v1 = vmul.f32 %v2450_v61, %v2450_v61  ;;  %v1619_v3 = vpop.f32.mrf.mxu0  ;;  %v2516_v4 = vsel %vm89_vm0, %v2470_v58, 0.0 }
  0xee   :  { %v2549_v7 = vsel %vm89_vm0, %v2481_v63, 0.0  ;;  %v2451_v8 = vsub.f32 %v1619_v3, %v3782_v41  ;;  %v1692_v9 = vpop.f32.mrf.mxu1 }
  0xef   :  { %2550 = vadd.xlane.f32.xlu1 %v2549_v7  ;;  %2535 = vadd.xlane.f32.xlu0 %v2534_v2  ;;  %v3360_v10 = vpop.f32.mrf.mxu0  ;;  %v2552_v13 = vsel %vm89_vm0, %v2482_v1, 0.0  ;;  %v2452_v17 = vsub.f32 %v1692_v9, %v3782_v41  ;;  %v58_v2 = vpop.permute.xlu0 %57 }
  0xf0   :  { %v2483_v11 = vmul.f32 %v2451_v8, %v2451_v8  ;;  %v3365_v12 = vpop.f32.mrf.mxu1  ;;  %vm68_vm3 = vcmp.eq.s32.totalorder %v3778_v39, %v58_v2  ;;  %v64_v7 = vpop.permute.xlu1 %63 }
  0xf1   :  { %v1765_v15 = vpop.f32.mrf.mxu0  ;;  %v2484_v25 = vmul.f32 %v2452_v17, %v2452_v17  ;;  %vm70_vm4 = vcmp.eq.s32.totalorder %v3778_v39, %v64_v7 }
  0xf2   :  { %v1838_v19 = vpop.f32.mrf.mxu1  ;;  %v2555_v22 = vsel %vm89_vm0, %v2483_v11, 0.0  ;;  %v2453_v26 = vsub.f32 %v1765_v15, %v3782_v41  ;;  %v72_v11 = vsel %vm68_vm3, %v14_v5, 0.0 }
  0xf3   :  { %2553 = vadd.xlane.f32.xlu1 %v2552_v13  ;;  %2538 = vadd.xlane.f32.xlu0 %v2537_v18  ;;  %v3370_v20 = vpop.f32.mrf.mxu0  ;;  %v2558_v37 = vsel %vm89_vm0, %v2484_v25, 0.0  ;;  %v2454_v59 = vsub.f32 %v1838_v19, %v3782_v41  ;;  %v16_v13 = vld [vmem:[%s4322_s0 + $0x10] sm:$0xff]  ;;  %v77_v17 = vsel %vm76_vm5, %v72_v11, 0.0  ;;  %v61_v19 = vpop.permute.xlu0 %60 }
  0xf4   :  { %v3375_v21 = vpop.f32.mrf.mxu1  ;;  %v2485_v35 = vmul.f32 %v2453_v26, %v2453_v26  ;;  %v74_v18 = vsel %vm70_vm4, %v16_v13, 0.0  ;;  %vm69_vm6 = vcmp.eq.s32.totalorder %v3778_v39, %v61_v19  ;;  %v17_v26 = vld [vmem:[%s4322_s0 + $0x18] sm:$0xff] }
  0xf5   :  { %v1911_v24 = vpop.f32.mrf.mxu0  ;;  %v2486_v3 = vmul.f32 %v2454_v59, %v2454_v59  ;;  %v73_v25 = vsel %vm69_vm6, %v15_v23, 0.0 }
  0xf6   :  { %v1984_v28 = vpop.f32.mrf.mxu1  ;;  %v2455_v36 = vsub.f32 %v1911_v24, %v3782_v41  ;;  %v2561_v50 = vsel %vm89_vm0, %v2485_v35, 0.0 }
  0xf7   :  { %2556 = vadd.xlane.f32.xlu1 %v2555_v22  ;;  %2547 = vadd.xlane.f32.xlu0 %v2546_v27  ;;  %v2456_v29 = vsub.f32 %v1984_v28, %v3782_v41  ;;  %v3380_v30 = vpop.f32.mrf.mxu0  ;;  %v2564_v12 = vsel %vm89_vm0, %v2486_v3, 0.0  ;;  %v83_v22 = vsel %vm76_vm5, %v74_v18, 0.0  ;;  %v80_v27 = vsel %vm76_vm5, %v73_v25, 0.0 }
  0xf8   :  { %v3385_v31 = vpop.f32.mrf.mxu1  ;;  %v2487_v49 = vmul.f32 %v2455_v36, %v2455_v36 }
  0xf9   :  { %v2488_v32 = vmul.f32 %v2456_v29, %v2456_v29  ;;  %v2057_v34 = vpop.f32.mrf.mxu0 }
  0xfa   :  { %v2457_v38 = vsub.f32 %v2057_v34, %v3782_v41  ;;  %v2130_v40 = vpop.f32.mrf.mxu1  ;;  %v2567_v60 = vsel %vm89_vm0, %v2487_v49, 0.0 }
  0xfb   :  { %2559 = vadd.xlane.f32.xlu1 %v2558_v37  ;;  %2541 = vadd.xlane.f32.xlu0 %v2540_v33  ;;  %v3390_v42 = vpop.f32.mrf.mxu0  ;;  %v2570_v44 = vsel %vm89_vm0, %v2488_v32, 0.0  ;;  %v2458_v45 = vsub.f32 %v2130_v40, %v3782_v41 }
  0xfc   :  { %v2489_v43 = vmul.f32 %v2457_v38, %v2457_v38  ;;  %v3395_v46 = vpop.f32.mrf.mxu1 }
  0xfd   :  { %v2203_v47 = vpop.f32.mrf.mxu0  ;;  %v2490_v53 = vmul.f32 %v2458_v45, %v2458_v45 }
  0xfe   :  { %v2276_v51 = vpop.f32.mrf.mxu1  ;;  %v2573_v54 = vsel %vm89_vm0, %v2489_v43, 0.0  ;;  %v2459_v55 = vsub.f32 %v2203_v47, %v3782_v41 }
  0xff   :  { %2562 = vadd.xlane.f32.xlu1 %v2561_v50  ;;  %2571 = vadd.xlane.f32.xlu0 %v2570_v44  ;;  %v3400_v52 = vpop.f32.mrf.mxu0  ;;  %v2576_v63 = vsel %vm89_vm0, %v2490_v53, 0.0  ;;  %v2460_v0 = vsub.f32 %v2276_v51, %v3782_v41 }
 0x100   :  { %v3405_v56 = vpop.f32.mrf.mxu1  ;;  %v2491_v62 = vmul.f32 %v2459_v55, %v2459_v55 }
 0x101   :  { %v2349_v57 = vpop.f32.mrf.mxu0  ;;  %v2492_v8 = vmul.f32 %v2460_v0, %v2460_v0 }
 0x102   :  { %v2422_v6 = vpop.f32.mrf.mxu1  ;;  %v2579_v9 = vsel %vm89_vm0, %v2491_v62, 0.0  ;;  %v2461_v10 = vsub.f32 %v2349_v57, %v3782_v41 }
 0x103   :  { %2568 = vadd.xlane.f32.xlu1 %v2567_v60  ;;  %2574 = vadd.xlane.f32.xlu0 %v2573_v54  ;;  %v3410_v61 = vpop.f32.mrf.mxu0  ;;  %v2582_v15 = vsel %vm89_vm0, %v2492_v8, 0.0  ;;  %v2462_v16 = vsub.f32 %v2422_v6, %v3782_v41  ;;  %v67_v41 = vpop.permute.xlu1 %66 }
 0x104   :  { %v3415_v1 = vpop.f32.mrf.mxu1  ;;  %v2493_v14 = vmul.f32 %v2461_v10, %v2461_v10  ;;  %vm71_vm7 = vcmp.eq.s32.totalorder %v3778_v39, %v67_v41 }
 0x105   :  { %v2494_v20 = vmul.f32 %v2462_v16, %v2462_v16  ;;  %v75_v28 = vsel %vm71_vm7, %v17_v26, 0.0 }
 0x106   :  { %v2585_v21 = vsel %vm89_vm0, %v2493_v14, 0.0  ;;  %v86_v29 = vsel %vm76_vm5, %v75_v28, 0.0 }
 0x107   :  { %2517 = vadd.xlane.f32.xlu1 %v2516_v4  ;;  %2577 = vadd.xlane.f32.xlu0 %v2576_v63  ;;  %v2588_v24 = vsel %vm89_vm0, %v2494_v20, 0.0 }
 0x10b   :  { %2565 = vadd.xlane.f32.xlu1 %v2564_v12  ;;  %2580 = vadd.xlane.f32.xlu0 %v2579_v9 }
 0x10f   :  { %2583 = vadd.xlane.f32.xlu0 %v2582_v15  ;;  %78 = vadd.xlane.f32.xlu1 %v77_v17 }
 0x113   :  { %2586 = vadd.xlane.f32.xlu0 %v2585_v21  ;;  %84 = vadd.xlane.f32.xlu1 %v83_v22 }
 0x117   :  { %2589 = vadd.xlane.f32.xlu0 %v2588_v24 }
 0x11b   :  { %81 = vadd.xlane.f32.xlu0 %v80_v27 }
 0x11f   :  { %87 = vadd.xlane.f32.xlu0 %v86_v29 }
 0x154   :  { %v2500_v30 = vpop.xlane.xlu1 %2499  ;;  %v2497_v31 = vpop.xlane.xlu0 %2496 }
 0x155   :  { %v2597_v32 = vrot.slane %v2500_v30, 4  ;;  %v2591_v33 = vrot.slane %v2497_v31, 4 }
 0x157   :  { %v2598_v34 = vadd.f32 %v2597_v32, %v2500_v30  ;;  %v2592_v35 = vadd.f32 %v2591_v33, %v2497_v31 }
 0x158   :  { %v2503_v36 = vpop.xlane.xlu1 %2502 }
 0x159   :  { %v2599_v39 = vrot.slane %v2598_v34, 2  ;;  %v2593_v37 = vrot.slane %v2592_v35, 2  ;;  %v2603_v38 = vrot.slane %v2503_v36, 4 }
 0x15b   :  { %v2600_v40 = vadd.f32 %v2599_v39, %v2598_v34  ;;  %v2594_v42 = vadd.f32 %v2593_v37, %v2592_v35  ;;  %v2604_v43 = vadd.f32 %v2603_v38, %v2503_v36 }
 0x15c   :  { %v2506_v44 = vpop.xlane.xlu1 %2505 }
 0x15d   :  { %v2601_v45 = vrot.slane %v2600_v40, 1  ;;  %v2595_v46 = vrot.slane %v2594_v42, 1  ;;  %v2605_v47 = vrot.slane %v2604_v43, 2  ;;  %v2609_v48 = vrot.slane %v2506_v44, 4 }
 0x15f   :  { %v3871_v49 = vadd.f32 %v2601_v45, %v2600_v40  ;;  %v3873_v50 = vadd.f32 %v2595_v46, %v2594_v42  ;;  %v2606_v51 = vadd.f32 %v2605_v47, %v2604_v43  ;;  %v2610_v52 = vadd.f32 %v2609_v48, %v2506_v44 }
 0x160   :  { %v2509_v53 = vpop.xlane.xlu1 %2508 }
 0x161   :  { %3421 = vrsqrt.f32 %v3873_v50  ;;  %v2607_v54 = vrot.slane %v2606_v51, 1  ;;  %v2611_v55 = vrot.slane %v2610_v52, 2  ;;  %v2615_v56 = vrot.slane %v2509_v53, 4 }
 0x162   :  { %3423 = vrsqrt.f32 %v3871_v49  ;;  %vm2792_vm8 = vcmp.eq.f32.partialorder %v3871_v49, inf  ;;  %vm2794_vm9 = vcmp.eq.f32.partialorder %v3871_v49, 0.0  ;;  %v2795_v32 = vand.u32 2147483648, %v3871_v49 }
 0x163   :  { %v2612_v59 = vadd.f32 %v2611_v55, %v2610_v52  ;;  %v2616_v60 = vadd.f32 %v2615_v56, %v2509_v53  ;;  %v3877_v61 = vadd.f32 %v2607_v54, %v2606_v51  ;;  %vm2785_vm10 = vcmp.eq.f32.partialorder %v3873_v50, inf }
 0x164   :  { %v2512_v57 = vpop.xlane.xlu1 %2511  ;;  %v2521_v58 = vpop.xlane.xlu0 %2520  ;;  %vm2787_vm11 = vcmp.eq.f32.partialorder %v3873_v50, 0.0  ;;  %v2788_v39 = vand.u32 2147483648, %v3873_v50 }
 0x165   :  { %v2621_v6 = vrot.slane %v2512_v57, 4  ;;  %v2639_v62 = vrot.slane %v2521_v58, 4  ;;  %v2613_v63 = vrot.slane %v2612_v59, 1  ;;  %v2617_v0 = vrot.slane %v2616_v60, 2 }
 0x166   :  { %3425 = vrsqrt.f32 %v3877_v61  ;;  %vm2799_vm12 = vcmp.eq.f32.partialorder %v3877_v61, inf  ;;  %v2802_v44 = vand.u32 2147483648, %v3877_v61  ;;  %vm2801_vm14 = vcmp.eq.f32.partialorder %v3877_v61, 0.0 }
 0x167   :  { %v2622_v1 = vadd.f32 %v2621_v6, %v2512_v57  ;;  %v2640_v2 = vadd.f32 %v2639_v62, %v2521_v58  ;;  %v3879_v5 = vadd.f32 %v2613_v63, %v2612_v59  ;;  %v2618_v9 = vadd.f32 %v2617_v0, %v2616_v60 }
 0x168   :  { %v2515_v3 = vpop.xlane.xlu1 %2514  ;;  %v2524_v4 = vpop.xlane.xlu0 %2523 }
 0x169   :  { %v2627_v7 = vrot.slane %v2515_v3, 4  ;;  %v2645_v8 = vrot.slane %v2524_v4, 4  ;;  %v2623_v10 = vrot.slane %v2622_v1, 2  ;;  %v2641_v11 = vrot.slane %v2640_v2, 2 }
 0x16a   :  { %3427 = vrsqrt.f32 %v3879_v5  ;;  %v2619_v20 = vrot.slane %v2618_v9, 1  ;;  %v2809_v48 = vand.u32 2147483648, %v3879_v5  ;;  %vm2806_vm13 = vcmp.eq.f32.partialorder %v3879_v5, inf }
 0x16b   :  { %v2628_v12 = vadd.f32 %v2627_v7, %v2515_v3  ;;  %v2646_v13 = vadd.f32 %v2645_v8, %v2524_v4  ;;  %v2624_v14 = vadd.f32 %v2623_v10, %v2622_v1  ;;  %v2642_v15 = vadd.f32 %v2641_v11, %v2640_v2 }
 0x16c   :  { %v2527_v16 = vpop.xlane.xlu0 %2526  ;;  %v3889_v33 = vadd.f32 %v2619_v20, %v2618_v9  ;;  %vm2808_vm15 = vcmp.eq.f32.partialorder %v3879_v5, 0.0 }
 0x16d   :  { %v2629_v17 = vrot.slane %v2628_v12, 2  ;;  %v2647_v18 = vrot.slane %v2646_v13, 2  ;;  %v2651_v19 = vrot.slane %v2527_v16, 4  ;;  %v2643_v21 = vrot.slane %v2642_v15, 1 }
 0x16e   :  { %v3422_v22 = vpop.eup %3421  ;;  %v2625_v23 = vrot.slane %v2624_v14, 1 }
 0x16f   :  { %v2630_v41 = vadd.f32 %v2629_v17, %v2628_v12  ;;  %v2648_v24 = vadd.f32 %v2647_v18, %v2646_v13  ;;  %v2652_v25 = vadd.f32 %v2651_v19, %v2527_v16  ;;  %v3424_v26 = vpop.eup %3423  ;;  %v3883_v27 = vadd.f32 %v2643_v21, %v2642_v15 }
 0x170   :  { %v2530_v28 = vpop.xlane.xlu0 %2529  ;;  %v2784_v29 = vmul.f32 %v3422_v22, %v3873_v50  ;;  %v2791_v35 = vmul.f32 %v3424_v26, %v3871_v49  ;;  %v3893_v36 = vadd.f32 %v2625_v23, %v2624_v14 }
 0x171   :  { %v2631_v30 = vrot.slane %v2630_v41, 1  ;;  %v2653_v31 = vrot.slane %v2652_v25, 2  ;;  %v2649_v34 = vrot.slane %v2648_v24, 1  ;;  %3429 = vrsqrt.f32 %v3883_v27 }
 0x172   :  { %v2657_v38 = vrot.slane %v2530_v28, 4  ;;  %v2786_v43 = vsel %vm2785_vm10, %v3873_v50, %v2784_v29  ;;  %3431 = vrsqrt.f32 %v3889_v33  ;;  %v2793_v52 = vsel %vm2792_vm8, %v3871_v49, %v2791_v35 }
 0x173   :  { %v2654_v37 = vadd.f32 %v2653_v31, %v2652_v25  ;;  %v3901_v45 = vadd.f32 %v2631_v30, %v2630_v41  ;;  %v3904_v46 = vadd.f32 %v2649_v34, %v2648_v24  ;;  %v3426_v51 = vpop.eup %3425  ;;  %3433 = vrsqrt.f32 %v3893_v36 }
 0x174   :  { %v2545_v40 = vpop.xlane.xlu1 %2544  ;;  %v2533_v42 = vpop.xlane.xlu0 %2532  ;;  %v2658_v47 = vadd.f32 %v2657_v38, %v2530_v28  ;;  %v2844_v55 = vand.u32 2147483648, %v3883_v27  ;;  %v3915_v60 = vsel %vm2787_vm11, %v2788_v39, %v2786_v43  ;;  %v2798_v1 = vmul.f32 %v3426_v51, %v3877_v61 }
 0x175   :  { %v2687_v53 = vrot.slane %v2545_v40, 4  ;;  %v2663_v54 = vrot.slane %v2533_v42, 4  ;;  %v2655_v56 = vrot.slane %v2654_v37, 1  ;;  %3435 = vrsqrt.f32 %v3901_v45 }
 0x176   :  { %v2659_v57 = vrot.slane %v2658_v47, 2  ;;  %3437 = vrsqrt.f32 %v3904_v46  ;;  %v3922_v3 = vsel %vm2794_vm9, %v2795_v32, %v2793_v52  ;;  %v2851_v10 = vand.u32 2147483648, %v3904_v46 }
 0x177   :  { %v3428_v6 = vpop.eup %3427  ;;  %v2688_v62 = vadd.f32 %v2687_v53, %v2545_v40  ;;  %v2664_v63 = vadd.f32 %v2663_v54, %v2533_v42  ;;  %v3928_v11 = vadd.f32 %v2655_v56, %v2654_v37  ;;  %vm2841_vm0 = vcmp.eq.f32.partialorder %v3883_v27, inf }
 0x178   :  { %v2551_v58 = vpop.xlane.xlu1 %2550  ;;  %v2536_v59 = vpop.xlane.xlu0 %2535  ;;  %v2660_v2 = vadd.f32 %v2659_v57, %v2658_v47  ;;  %v2805_v9 = vmul.f32 %v3428_v6, %v3879_v5  ;;  %v2800_v21 = vsel %vm2799_vm12, %v3877_v61, %v2798_v1  ;;  %v2816_v52 = vand.u32 2147483648, %v3889_v33 }
 0x179   :  { %v2699_v0 = vrot.slane %v2551_v58, 4  ;;  %v2689_v50 = vrot.slane %v2688_v62, 2  ;;  %v2665_v4 = vrot.slane %v2664_v63, 2  ;;  %v2669_v8 = vrot.slane %v2536_v59, 4 }
 0x17a   :  { %v2661_v12 = vrot.slane %v2660_v2, 1  ;;  %3439 = vrsqrt.f32 %v3928_v11  ;;  %v2807_v31 = vsel %vm2806_vm13, %v3879_v5, %v2805_v9  ;;  %v2858_v47 = vand.u32 2147483648, %v3928_v11 }
 0x17b   :  { %v2700_v7 = vadd.f32 %v2699_v0, %v2551_v58  ;;  %v2690_v49 = vadd.f32 %v2689_v50, %v2688_v62  ;;  %v2666_v15 = vadd.f32 %v2665_v4, %v2664_v63  ;;  %v2670_v17 = vadd.f32 %v2669_v8, %v2536_v59 }
 0x17c   :  { %v2554_v13 = vpop.xlane.xlu1 %2553  ;;  %v2539_v14 = vpop.xlane.xlu0 %2538  ;;  %v3931_v18 = vadd.f32 %v2661_v12, %v2660_v2  ;;  %v3953_v51 = vsel %vm2801_vm14, %v2802_v44, %v2800_v21  ;;  %v3965_v59 = vsel %vm2808_vm15, %v2809_v48, %v2807_v31  ;;  %vm2843_vm1 = vcmp.eq.f32.partialorder %v3883_v27, 0.0 }
 0x17d   :  { %v2701_v16 = vrot.slane %v2700_v7, 2  ;;  %v2705_v19 = vrot.slane %v2554_v13, 4  ;;  %v2675_v20 = vrot.slane %v2539_v14, 4  ;;  %v2691_v22 = vrot.slane %v2690_v49, 1 }
 0x17e   :  { %v2667_v23 = vrot.slane %v2666_v15, 1  ;;  %v2671_v24 = vrot.slane %v2670_v17, 2  ;;  %v3430_v25 = vpop.eup %3429  ;;  %3441 = vrsqrt.f32 %v3931_v18  ;;  %vm2848_vm2 = vcmp.eq.f32.partialorder %v3904_v46, inf }
 0x17f   :  { %v2702_v41 = vadd.f32 %v2701_v16, %v2700_v7  ;;  %v2706_v26 = vadd.f32 %v2705_v19, %v2554_v13  ;;  %v2676_v28 = vadd.f32 %v2675_v20, %v2539_v14  ;;  %v2840_v32 = vmul.f32 %v3430_v25, %v3883_v27  ;;  %v3945_v43 = vpop.eup %3431 }
 0x180   :  { %v2557_v29 = vpop.xlane.xlu1 %2556  ;;  %v2548_v30 = vpop.xlane.xlu0 %2547  ;;  %v3941_v34 = vadd.f32 %v2691_v22, %v2690_v49  ;;  %v3943_v35 = vadd.f32 %v2667_v23, %v2666_v15  ;;  %v2672_v37 = vadd.f32 %v2671_v24, %v2670_v17  ;;  %vm2850_vm3 = vcmp.eq.f32.partialorder %v3904_v46, 0.0 }
 0x181   :  { %v2703_v39 = vrot.slane %v2702_v41, 1  ;;  %v2707_v38 = vrot.slane %v2706_v26, 2  ;;  %v2677_v40 = vrot.slane %v2676_v28, 2  ;;  %v2711_v42 = vrot.slane %v2557_v29, 4  ;;  %v3956_v53 = vpop.eup %3433 }
 0x182   :  { %3443 = vrsqrt.f32 %v3941_v34  ;;  %v2673_v56 = vrot.slane %v2672_v37, 1  ;;  %v2693_v62 = vrot.slane %v2548_v30, 4  ;;  %v3967_v63 = vpop.eup %3435  ;;  %v2842_v0 = vsel %vm2841_vm0, %v3883_v27, %v2840_v32 }
 0x183   :  { %v3959_v54 = vadd.f32 %v2703_v39, %v2702_v41  ;;  %v2708_v61 = vadd.f32 %v2707_v38, %v2706_v26  ;;  %v2678_v44 = vadd.f32 %v2677_v40, %v2676_v28  ;;  %v2712_v6 = vadd.f32 %v2711_v42, %v2557_v29  ;;  %v3438_v50 = vpop.eup %3437 }
 0x184   :  { %v2560_v57 = vpop.xlane.xlu1 %2559  ;;  %v2542_v58 = vpop.xlane.xlu0 %2541  ;;  %3445 = vrsqrt.f32 %v3943_v35  ;;  %v3973_v1 = vadd.f32 %v2673_v56, %v2672_v37  ;;  %v2694_v7 = vadd.f32 %v2693_v62, %v2548_v30  ;;  %v2900_v8 = vand.u32 2147483648, %v3941_v34 }
 0x185   :  { %v2717_v2 = vrot.slane %v2560_v57, 4  ;;  %v2709_v4 = vrot.slane %v2708_v61, 1  ;;  %v2679_v5 = vrot.slane %v2678_v44, 1  ;;  %v2713_v48 = vrot.slane %v2712_v6, 2 }
 0x186   :  { %3447 = vrsqrt.f32 %v3959_v54  ;;  %v2681_v12 = vrot.slane %v2542_v58, 4  ;;  %v2695_v17 = vrot.slane %v2694_v7, 2  ;;  %v2847_v23 = vmul.f32 %v3438_v50, %v3904_v46 }
 0x187   :  { %v2718_v9 = vadd.f32 %v2717_v2, %v2560_v57  ;;  %v3979_v49 = vadd.f32 %v2709_v4, %v2708_v61  ;;  %v3981_v15 = vadd.f32 %v2679_v5, %v2678_v44  ;;  %v2714_v16 = vadd.f32 %v2713_v48, %v2712_v6  ;;  %v3440_v31 = vpop.eup %3439 }
 0x188   :  { %v2563_v13 = vpop.xlane.xlu1 %2562  ;;  %v2572_v14 = vpop.xlane.xlu0 %2571  ;;  %v2682_v20 = vadd.f32 %v2681_v12, %v2542_v58  ;;  %3449 = vrsqrt.f32 %v3973_v1  ;;  %v2696_v24 = vadd.f32 %v2695_v17, %v2694_v7  ;;  %v2849_v7 = vsel %vm2848_vm2, %v3904_v46, %v2847_v23 }
 0x189   :  { %v2719_v19 = vrot.slane %v2718_v9, 2  ;;  %v2723_v21 = vrot.slane %v2563_v13, 4  ;;  %v2741_v22 = vrot.slane %v2572_v14, 4  ;;  %v2715_v41 = vrot.slane %v2714_v16, 1 }
 0x18a   :  { %3451 = vrsqrt.f32 %v3979_v49  ;;  %v2683_v26 = vrot.slane %v2682_v20, 2  ;;  %v2697_v39 = vrot.slane %v2696_v24, 1  ;;  %v4005_v12 = vsel %vm2843_vm1, %v2844_v55, %v2842_v0 }
 0x18b   :  { %v2720_v25 = vadd.f32 %v2719_v19, %v2718_v9  ;;  %v2724_v28 = vadd.f32 %v2723_v21, %v2563_v13  ;;  %v3986_v32 = vadd.f32 %v2715_v41, %v2714_v16  ;;  %v2742_v37 = vadd.f32 %v2741_v22, %v2572_v14  ;;  %v3442_v44 = vpop.eup %3441 }
 0x18c   :  { %v2569_v29 = vpop.xlane.xlu1 %2568  ;;  %v2575_v30 = vpop.xlane.xlu0 %2574  ;;  %3453 = vrsqrt.f32 %v3981_v15  ;;  %v2684_v42 = vadd.f32 %v2683_v26, %v2682_v20  ;;  %v3990_v57 = vadd.f32 %v2697_v39, %v2696_v24  ;;  %v3998_v9 = vmul.f32 %v3440_v31, %v3928_v11 }
 0x18d   :  { %v2735_v38 = vrot.slane %v2569_v29, 4  ;;  %v2721_v40 = vrot.slane %v2720_v25, 1  ;;  %v2725_v56 = vrot.slane %v2724_v28, 2  ;;  %3455 = vrsqrt.f32 %v3986_v32 }
 0x18e   :  { %v2743_v58 = vrot.slane %v2742_v37, 2  ;;  %v2685_v62 = vrot.slane %v2684_v42, 1  ;;  %v2747_v50 = vrot.slane %v2575_v30, 4  ;;  %3457 = vrsqrt.f32 %v3990_v57 }
 0x18f   :  { %v2736_v61 = vadd.f32 %v2735_v38, %v2569_v29  ;;  %v3992_v6 = vadd.f32 %v2721_v40, %v2720_v25  ;;  %v2726_v2 = vadd.f32 %v2725_v56, %v2724_v28  ;;  %v3444_v48 = vpop.eup %3443  ;;  %v4014_v23 = vmul.f32 %v3442_v44, %v3931_v18 }
 0x190   :  { %v2518_v4 = vpop.xlane.xlu1 %2517  ;;  %v2578_v5 = vpop.xlane.xlu0 %2577  ;;  %v4009_v13 = vadd.f32 %v2685_v62, %v2684_v42  ;;  %v2744_v16 = vadd.f32 %v2743_v58, %v2742_v37  ;;  %v2748_v20 = vadd.f32 %v2747_v50, %v2575_v30  ;;  %v4017_v27 = vmul.f32 %v3444_v48, %v3941_v34 }
 0x191   :  { %3459 = vrsqrt.f32 %v3992_v6  ;;  %v2727_v14 = vrot.slane %v2726_v2, 1  ;;  %v4011_v17 = vpop.eup %3445  ;;  %v2737_v19 = vrot.slane %v2736_v61, 2  ;;  %v2633_v21 = vrot.slane %v2518_v4, 4 }
 0x192   :  { %v2753_v22 = vrot.slane %v2578_v5, 4  ;;  %3461 = vrsqrt.f32 %v4009_v13  ;;  %v2745_v55 = vrot.slane %v2744_v16, 1  ;;  %v2749_v26 = vrot.slane %v2748_v20, 2 }
 0x193   :  { %v3448_v24 = vpop.eup %3447  ;;  %v2738_v25 = vadd.f32 %v2737_v19, %v2736_v61  ;;  %v2634_v28 = vadd.f32 %v2633_v21, %v2518_v4  ;;  %vm2855_vm4 = vcmp.eq.f32.partialorder %v3928_v11, inf  ;;  %v4021_v30 = vadd.f32 %v2727_v14, %v2726_v2 }
 0x194   :  { %v2566_v0 = vpop.xlane.xlu1 %2565  ;;  %v2581_v41 = vpop.xlane.xlu0 %2580  ;;  %v2754_v29 = vadd.f32 %v2753_v22, %v2578_v5  ;;  %v4023_v31 = vadd.f32 %v2745_v55, %v2744_v16  ;;  %v2750_v40 = vadd.f32 %v2749_v26, %v2748_v20  ;;  %vm2862_vm5 = vcmp.eq.f32.partialorder %v3931_v18, inf }
 0x195   :  { %v2729_v39 = vrot.slane %v2566_v0, 4  ;;  %v2759_v37 = vrot.slane %v2581_v41, 4  ;;  %v2739_v38 = vrot.slane %v2738_v25, 1  ;;  %v2635_v42 = vrot.slane %v2634_v28, 2  ;;  %v4026_v58 = vpop.eup %3449 }
 0x196   :  { %v2755_v56 = vrot.slane %v2754_v29, 2  ;;  %v4029_v61 = vmul.f32 %v3448_v24, %v3959_v54  ;;  %v2907_v44 = vand.u32 2147483648, %v3990_v57  ;;  %3463 = vrsqrt.f32 %v4023_v31 }
 0x197   :  { %v2730_v62 = vadd.f32 %v2729_v39, %v2566_v0  ;;  %v4033_v50 = vpop.eup %3451  ;;  %v4035_v4 = vadd.f32 %v2739_v38, %v2738_v25  ;;  %v2751_v5 = vrot.slane %v2750_v40, 1  ;;  %v2636_v48 = vadd.f32 %v2635_v42, %v2634_v28 }
 0x198   :  { %v2584_v2 = vpop.xlane.xlu0 %2583  ;;  %v2756_v14 = vadd.f32 %v2755_v56, %v2754_v29  ;;  %3465 = vrsqrt.f32 %v4021_v30  ;;  %v2760_v19 = vadd.f32 %v2759_v37, %v2581_v41  ;;  %v4048_v0 = vsel %vm2850_vm3, %v2851_v10, %v2849_v7 }
 0x199   :  { %v2731_v16 = vrot.slane %v2730_v62, 2  ;;  %v2765_v20 = vrot.slane %v2584_v2, 4  ;;  %v4038_v21 = vpop.eup %3453  ;;  %3467 = vrsqrt.f32 %v4035_v4  ;;  %v4042_v55 = vadd.f32 %v2751_v5, %v2750_v40 }
 0x19a   :  { %vm2857_vm6 = vcmp.eq.f32.partialorder %v3928_v11, 0.0  ;;  %v4051_v24 = vpop.eup %3455  ;;  %v2637_v41 = vrot.slane %v2636_v48, 1  ;;  %v2757_v25 = vrot.slane %v2756_v14, 1  ;;  %v2761_v28 = vrot.slane %v2760_v19, 2 }
 0x19b   :  { %v2732_v26 = vadd.f32 %v2731_v16, %v2730_v62  ;;  %3469 = vrsqrt.f32 %v4042_v55  ;;  %v2766_v37 = vadd.f32 %v2765_v20, %v2584_v2  ;;  %v3458_v40 = vpop.eup %3457  ;;  %v2856_v2 = vsel %vm2855_vm4, %v3928_v11, %v3998_v9 }
 0x19c   :  { %v2587_v29 = vpop.xlane.xlu0 %2586  ;;  %v4055_v42 = vadd.f32 %v2637_v41, %v2636_v48  ;;  %v4057_v46 = vadd.f32 %v2757_v25, %v2756_v14  ;;  %v2762_v7 = vadd.f32 %v2761_v28, %v2760_v19  ;;  %v4062_v5 = vmul.f32 %v3458_v40, %v3990_v57 }
 0x19d   :  { %v2771_v38 = vrot.slane %v2587_v29, 4  ;;  %v2733_v10 = vrot.slane %v2732_v26, 1  ;;  %v2767_v62 = vrot.slane %v2766_v37, 2  ;;  %v2863_v19 = vsel %vm2862_vm5, %v3931_v18, %v4014_v23 }
 0x19e   :  { %v4059_v56 = vpop.eup %3459  ;;  %3471 = vrsqrt.f32 %v4055_v42  ;;  %v2763_v14 = vrot.slane %v2762_v7, 1  ;;  %vm2864_vm7 = vcmp.eq.f32.partialorder %v3931_v18, 0.0  ;;  %v2868_v23 = vmul.f32 %v4011_v17, %v3943_v35 }
 0x19f   :  { %v2772_v16 = vadd.f32 %v2771_v38, %v2587_v29  ;;  %v4069_v48 = vadd.f32 %v2733_v10, %v2732_v26  ;;  %v3462_v41 = vpop.eup %3461  ;;  %3473 = vrsqrt.f32 %v4057_v46  ;;  %v2768_v25 = vadd.f32 %v2767_v62, %v2766_v37 }
 0x1a0   :  { %v2590_v20 = vpop.xlane.xlu0 %2589  ;;  %v4077_v9 = vadd.f32 %v2763_v14, %v2762_v7  ;;  %v2865_v26 = vand.u32 2147483648, %v3931_v18  ;;  %v2859_v37 = vsel %vm2857_vm6, %v2858_v47, %v2856_v2  ;;  %vm2869_vm8 = vcmp.eq.f32.partialorder %v3943_v35, inf }
 0x1a1   :  { %v2773_v28 = vrot.slane %v2772_v16, 2  ;;  %v2777_v29 = vrot.slane %v2590_v20, 4  ;;  %3475 = vrsqrt.f32 %v4069_v48  ;;  %v2769_v38 = vrot.slane %v2768_v25, 1 }
 0x1a2   :  { %3477 = vrsqrt.f32 %v4077_v9  ;;  %v2866_v62 = vsel %vm2864_vm7, %v2865_v26, %v2863_v19  ;;  %vm2871_vm9 = vcmp.eq.f32.partialorder %v3943_v35, 0.0  ;;  %v2870_v17 = vsel %vm2869_vm8, %v3943_v35, %v2868_v23 }
 0x1a3   :  { %v2774_v40 = vadd.f32 %v2773_v28, %v2772_v16  ;;  %v2778_v10 = vadd.f32 %v2777_v29, %v2590_v20  ;;  %v3464_v7 = vpop.eup %3463  ;;  %v4089_v14 = vadd.f32 %v2769_v38, %v2768_v25  ;;  %v2872_v20 = vand.u32 2147483648, %v3943_v35 }
 0x1a4   :  { %v4093_v16 = vmul.f32 %v3464_v7, %v4023_v31  ;;  %v2875_v11 = vmul.f32 %v4026_v58, %v3973_v1  ;;  %vm3075_vm10 = vcmask 1041409   ;;  %vm2876_vm11 = vcmp.eq.f32.partialorder %v3973_v1, inf }
 0x1a5   :  { %v2775_v18 = vrot.slane %v2774_v40, 1  ;;  %v2779_v22 = vrot.slane %v2778_v10, 2  ;;  %v4099_v47 = vpop.eup %3465  ;;  %3479 = vrsqrt.f32 %v4089_v14  ;;  %vm3077_vm12 = vcmask 1042434  }
 0x1a6   :  { %v3468_v25 = vpop.eup %3467  ;;  %v2877_v28 = vsel %vm2876_vm11, %v3973_v1, %v2875_v11  ;;  %vm2878_vm13 = vcmp.eq.f32.partialorder %v3973_v1, 0.0  ;;  %v2879_v29 = vand.u32 2147483648, %v3973_v1  ;;  %v2882_v58 = vmul.f32 %v4038_v21, %v3981_v15 }
 0x1a7   :  { %v4102_v2 = vadd.f32 %v2775_v18, %v2774_v40  ;;  %v2780_v19 = vadd.f32 %v2779_v22, %v2778_v10  ;;  %vm3079_vm14 = vcmask 1043459   ;;  %v4111_v26 = vmul.f32 %v3468_v25, %v4035_v4 }
 0x1a8   :  { %v2873_v22 = vsel %vm2871_vm9, %v2872_v20, %v2870_v17  ;;  %vm2883_vm15 = vcmp.eq.f32.partialorder %v3981_v15, inf  ;;  %vm3081_vm0 = vcmask 1044484   ;;  %vm2813_vm1 = vcmp.eq.f32.partialorder %v3889_v33, inf  ;;  %v3470_v40 = vpop.eup %3469  ;;  %v82_v20 = vpop.xlane.xlu0 %81 }
 0x1a9   :  { %v2781_v38 = vrot.slane %v2780_v19, 1  ;;  %3481 = vrsqrt.f32 %v4102_v2  ;;  %v2880_v1 = vsel %vm2878_vm13, %v2879_v29, %v2877_v28  ;;  %v2884_v10 = vsel %vm2883_vm15, %v3981_v15, %v2882_v58 }
 0x1aa   :  { %v2886_v21 = vand.u32 2147483648, %v3981_v15  ;;  %vm3083_vm2 = vcmask 1045509   ;;  %vm3087_vm3 = vcmask 1047559   ;;  %vm2815_vm4 = vcmp.eq.f32.partialorder %v3889_v33, 0.0 }
 0x1ab   :  { %v4122_v35 = vmul.f32 %v3470_v40, %v4042_v55  ;;  %v4124_v23 = vadd.f32 %v2781_v38, %v2780_v19  ;;  %vm2885_vm5 = vcmp.eq.f32.partialorder %v3981_v15, 0.0  ;;  %v2889_v7 = vmul.f32 %v3462_v41, %v4009_v13  ;;  %v3472_v11 = vpop.eup %3471 }
 0x1ac   :  { %vm3085_vm6 = vcmask 1046534   ;;  %v2887_v18 = vsel %vm2885_vm5, %v2886_v21, %v2884_v10  ;;  %vm2890_vm7 = vcmp.eq.f32.partialorder %v4009_v13, inf  ;;  %vm2892_vm8 = vcmp.eq.f32.partialorder %v4009_v13, 0.0  ;;  %v4134_v15 = vpop.eup %3473 }
 0x1ad   :  { %v2893_v17 = vand.u32 2147483648, %v4009_v13  ;;  %v2891_v25 = vsel %vm2890_vm7, %v4009_v13, %v2889_v7  ;;  %v3019_v28 = vmul.f32 0.001, %v4005_v12  ;;  %v3020_v19 = vmul.f32 0.001, %v4048_v0 }
 0x1ae   :  { %v3021_v29 = vmul.f32 0.001, %v2859_v37  ;;  %vm3118_vm9 = vcmask 7168   ;;  %v3022_v58 = vmul.f32 0.001, %v2866_v62  ;;  %v4136_v10 = vpop.eup %3475  ;;  %vm2897_vm11 = vcmp.eq.f32.partialorder %v3941_v34, inf }
 0x1af   :  { %v2894_v41 = vsel %vm2892_vm8, %v2893_v17, %v2891_v25  ;;  %v3023_v38 = vmul.f32 0.001, %v2873_v22  ;;  %v3024_v40 = vmul.f32 0.001, %v2880_v1  ;;  %v3025_v21 = vmul.f32 0.001, %v2887_v18  ;;  %v4146_v62 = vpop.eup %3477 }
 0x1b0   :  { %v3026_v39 = vmul.f32 0.001, %v2894_v41  ;;  %v3089_v13 = vsel %vm3075_vm10, %v3020_v19, %v3019_v28  ;;  %v3008_v7 = vsub.f32 0.0, %v82_v20  ;;  %v2812_v0 = vmul.f32 %v3945_v43, %v3889_v33 }
 0x1b1   :  { %v3090_v12 = vsel %vm3077_vm12, %v3021_v29, %v3089_v13  ;;  %v2819_v37 = vmul.f32 %v3956_v53, %v3893_v36  ;;  %vm2820_vm13 = vcmp.eq.f32.partialorder %v3893_v36, inf  ;;  %vm2904_vm15 = vcmp.eq.f32.partialorder %v3990_v57, inf  ;;  %v79_v13 = vpop.xlane.xlu1 %78 }
 0x1b2   :  { %v3091_v22 = vsel %vm3079_vm14, %v3022_v58, %v3090_v12  ;;  %vm2822_vm5 = vcmp.eq.f32.partialorder %v3893_v36, 0.0  ;;  %v2823_v1 = vand.u32 2147483648, %v3893_v36  ;;  %v2826_v18 = vmul.f32 %v3967_v63, %v3901_v45  ;;  %v4166_v19 = vpop.eup %3479 }
 0x1b3   :  { %v3092_v43 = vsel %vm3081_vm0, %v3023_v38, %v3091_v22  ;;  %v2814_v53 = vsel %vm2813_vm1, %v3889_v33, %v2812_v0  ;;  %v2821_v17 = vsel %vm2820_vm13, %v3893_v36, %v2819_v37  ;;  %vm2827_vm7 = vcmp.eq.f32.partialorder %v3901_v45, inf }
 0x1b4   :  { %v3093_v20 = vsel %vm3083_vm2, %v3024_v40, %v3092_v43  ;;  %v2817_v25 = vsel %vm2815_vm4, %v2816_v52, %v2814_v53  ;;  %v2824_v28 = vsel %vm2822_vm5, %v2823_v1, %v2821_v17  ;;  %v2828_v63 = vsel %vm2827_vm7, %v3901_v45, %v2826_v18 }
 0x1b5   :  { %v3094_v29 = vsel %vm3085_vm6, %v3025_v21, %v3093_v20  ;;  %vm2829_vm1 = vcmp.eq.f32.partialorder %v3901_v45, 0.0  ;;  %v2830_v36 = vand.u32 2147483648, %v3901_v45  ;;  %v2833_v41 = vmul.f32 %v3472_v11, %v4055_v42 }
 0x1b6   :  { %v3095_v58 = vsel %vm3087_vm3, %v3026_v39, %v3094_v29  ;;  %vm2834_vm8 = vcmp.eq.f32.partialorder %v4055_v42, inf  ;;  %vm2836_vm13 = vcmp.eq.f32.partialorder %v4055_v42, 0.0  ;;  %v2837_v33 = vand.u32 2147483648, %v4055_v42  ;;  %v4178_v12 = vpop.eup %3481 }
 0x1b7   :  { %v3115_v52 = vadd.f32 %v3095_v58, %v3008_v7  ;;  %v2831_v38 = vsel %vm2829_vm1, %v2830_v36, %v2828_v63  ;;  %v2835_v40 = vsel %vm2834_vm8, %v4055_v42, %v2833_v41  ;;  %v3011_v21 = vmul.f32 0.001, %v3915_v60 }
 0x1b8   :  { %v2838_v45 = vsel %vm2836_vm13, %v2837_v33, %v2835_v40  ;;  %v3012_v11 = vmul.f32 0.001, %v3922_v3  ;;  %v3013_v39 = vmul.f32 0.001, %v3953_v51  ;;  %v3014_v0 = vmul.f32 0.001, %v3965_v59 }
 0x1b9   :  { %3483 = vrsqrt.f32 %v4124_v23  ;;  %3120 = vst.msk [vmem:[%s4323_s3 + $0x8] sm:$0xff] %vm3118_vm9, %v3115_v52  ;;  %v3015_v42 = vmul.f32 0.001, %v2817_v25  ;;  %v3016_v7 = vmul.f32 0.001, %v2824_v28  ;;  %v2898_v60 = vsel %vm2897_vm11, %v3941_v34, %v4017_v27 }
 0x1ba   :  { %v3017_v37 = vmul.f32 0.001, %v2831_v38  ;;  %v3018_v3 = vmul.f32 0.001, %v2838_v45  ;;  %v3076_v51 = vsel %vm3075_vm10, %v3012_v11, %v3011_v21  ;;  %v3007_v22 = vsub.f32 0.0, %v79_v13  ;;  %v85_v45 = vpop.xlane.xlu1 %84 }
 0x1bb   :  { %v3078_v59 = vsel %vm3077_vm12, %v3013_v39, %v3076_v51  ;;  %vm2899_vm4 = vcmp.eq.f32.partialorder %v3941_v34, 0.0  ;;  %v2905_v1 = vsel %vm2904_vm15, %v3990_v57, %v4062_v5  ;;  %vm2906_vm5 = vcmp.eq.f32.partialorder %v3990_v57, 0.0 }
 0x1bc   :  { %v3080_v18 = vsel %vm3079_vm14, %v3014_v0, %v3078_v59  ;;  %v2901_v27 = vsel %vm2899_vm4, %v2900_v8, %v2898_v60  ;;  %v2908_v43 = vsel %vm2906_vm5, %v2907_v44, %v2905_v1  ;;  %vm2911_vm11 = vcmp.eq.f32.partialorder %v3959_v54, inf }
 0x1bd   :  { %v3082_v53 = vsel %vm3081_vm0, %v3015_v42, %v3080_v18  ;;  %v2912_v17 = vsel %vm2911_vm11, %v3959_v54, %v4029_v61  ;;  %vm2913_vm7 = vcmp.eq.f32.partialorder %v3959_v54, 0.0  ;;  %v2917_v5 = vmul.f32 %v4033_v50, %v3979_v49 }
 0x1be   :  { %v3084_v20 = vsel %vm3083_vm2, %v3016_v7, %v3082_v53  ;;  %v2914_v34 = vand.u32 2147483648, %v3959_v54  ;;  %vm2918_vm15 = vcmp.eq.f32.partialorder %v3979_v49, inf  ;;  %v2921_v8 = vand.u32 2147483648, %v3979_v49 }
 0x1bf   :  { %v3086_v57 = vsel %vm3085_vm6, %v3017_v37, %v3084_v20  ;;  %v2919_v44 = vsel %vm2918_vm15, %v3979_v49, %v2917_v5  ;;  %vm2920_vm1 = vcmp.eq.f32.partialorder %v3979_v49, 0.0  ;;  %v2924_v61 = vmul.f32 %v4051_v24, %v3986_v32 }
 0x1c0   :  { %vm2960_vm8 = vcmp.eq.f32.partialorder %v4023_v31, inf  ;;  %vm2953_vm13 = vcmp.eq.f32.partialorder %v4035_v4, inf  ;;  %v3088_v50 = vsel %vm3087_vm3, %v3018_v3, %v3086_v57  ;;  %v2915_v54 = vsel %vm2913_vm7, %v2914_v34, %v2912_v17 }
 0x1c1   :  { %v2922_v25 = vsel %vm2920_vm1, %v2921_v8, %v2919_v44  ;;  %vm2925_vm4 = vcmp.eq.f32.partialorder %v3986_v32, inf  ;;  %v3114_v28 = vadd.f32 %v3088_v50, %v3007_v22  ;;  %v2928_v29 = vand.u32 2147483648, %v3986_v32 }
 0x1c2   :  { %v2926_v63 = vsel %vm2925_vm4, %v3986_v32, %v2924_v61  ;;  %v2931_v49 = vmul.f32 %v4059_v56, %v3992_v6  ;;  %vm2927_vm5 = vcmp.eq.f32.partialorder %v3986_v32, 0.0  ;;  %vm2932_vm11 = vcmp.eq.f32.partialorder %v3992_v6, inf }
 0x1c3   :  { %vm2934_vm15 = vcmp.eq.f32.partialorder %v3992_v6, 0.0  ;;  %v2938_v24 = vmul.f32 %v4099_v47, %v4021_v30  ;;  %3119 = vst.msk [vmem:[%s4323_s3] sm:$0xff] %vm3118_vm9, %v3114_v28  ;;  %v2929_v36 = vsel %vm2927_vm5, %v2928_v29, %v2926_v63  ;;  %v2935_v58 = vand.u32 2147483648, %v3992_v6 }
 0x1c4   :  { %v2933_v41 = vsel %vm2932_vm11, %v3992_v6, %v2931_v49  ;;  %vm2939_vm7 = vcmp.eq.f32.partialorder %v4021_v30, inf  ;;  %vm2941_vm1 = vcmp.eq.f32.partialorder %v4021_v30, 0.0  ;;  %v2942_v56 = vand.u32 2147483648, %v4021_v30 }
 0x1c5   :  { %v2940_v32 = vsel %vm2939_vm7, %v4021_v30, %v2938_v24  ;;  %v2945_v47 = vmul.f32 %v4136_v10, %v4069_v48  ;;  %v2936_v33 = vsel %vm2934_vm15, %v2935_v58, %v2933_v41  ;;  %vm2946_vm4 = vcmp.eq.f32.partialorder %v4069_v48, inf }
 0x1c6   :  { %vm2948_vm5 = vcmp.eq.f32.partialorder %v4069_v48, 0.0  ;;  %v2949_v52 = vand.u32 2147483648, %v4069_v48  ;;  %v3484_v38 = vpop.eup %3483  ;;  %v2943_v6 = vsel %vm2941_vm1, %v2942_v56, %v2940_v32  ;;  %v3027_v21 = vmul.f32 0.001, %v2901_v27 }
 0x1c7   :  { %v2947_v40 = vsel %vm2946_vm4, %v4069_v48, %v2945_v47  ;;  %v3028_v13 = vmul.f32 0.001, %v2908_v43  ;;  %v3029_v39 = vmul.f32 0.001, %v2915_v54  ;;  %v3030_v30 = vmul.f32 0.001, %v2922_v25 }
 0x1c8   :  { %v2950_v11 = vsel %vm2948_vm5, %v2949_v52, %v2947_v40  ;;  %v3031_v0 = vmul.f32 0.001, %v2929_v36  ;;  %v3032_v42 = vmul.f32 0.001, %v2936_v33  ;;  %v3033_v10 = vmul.f32 0.001, %v2943_v6  ;;  %v88_v52 = vpop.xlane.xlu0 %87 }
 0x1c9   :  { %v3034_v7 = vmul.f32 0.001, %v2950_v11  ;;  %v3096_v60 = vsel %vm3075_vm10, %v3028_v13, %v3027_v21  ;;  %v3009_v3 = vsub.f32 0.0, %v85_v45  ;;  %v2954_v48 = vsel %vm2953_vm13, %v4035_v4, %v4111_v26 }
 0x1ca   :  { %v3097_v37 = vsel %vm3077_vm12, %v3029_v39, %v3096_v60  ;;  %v2961_v51 = vsel %vm2960_vm8, %v4023_v31, %v4093_v16  ;;  %vm2955_vm11 = vcmp.eq.f32.partialorder %v4035_v4, 0.0  ;;  %vm2962_vm15 = vcmp.eq.f32.partialorder %v4023_v31, 0.0 }
 0x1cb   :  { %v3098_v22 = vsel %vm3079_vm14, %v3030_v30, %v3097_v37  ;;  %vm2967_vm7 = vcmp.eq.f32.partialorder %v4042_v55, inf  ;;  %v4324_v1 = vand.u32 2147483648, %v4035_v4  ;;  %v4325_v26 = vand.u32 2147483648, %v4023_v31 }
 0x1cc   :  { %v3099_v59 = vsel %vm3081_vm0, %v3031_v0, %v3098_v22  ;;  %v2968_v43 = vsel %vm2967_vm7, %v4042_v55, %v4122_v35  ;;  %vm2969_vm8 = vcmp.eq.f32.partialorder %v4042_v55, 0.0  ;;  %v2970_v53 = vand.u32 2147483648, %v4042_v55 }
 0x1cd   :  { %v2957_v18 = vsel %vm2955_vm11, %v4324_v1, %v2954_v48  ;;  %v2964_v27 = vsel %vm2962_vm15, %v4325_v26, %v2961_v51  ;;  %v3100_v16 = vsel %vm3083_vm2, %v3032_v42, %v3099_v59  ;;  %v2973_v17 = vmul.f32 %v4134_v15, %v4057_v46 }
 0x1ce   :  { %v3101_v5 = vsel %vm3085_vm6, %v3033_v10, %v3100_v16  ;;  %vm2974_vm13 = vcmp.eq.f32.partialorder %v4057_v46, inf  ;;  %v2977_v4 = vand.u32 2147483648, %v4057_v46  ;;  %v2980_v31 = vmul.f32 %v4146_v62, %v4077_v9 }
 0x1cf   :  { %v3102_v35 = vsel %vm3087_vm3, %v3034_v7, %v3101_v5  ;;  %v2975_v20 = vsel %vm2974_vm13, %v4057_v46, %v2973_v17  ;;  %vm2976_vm1 = vcmp.eq.f32.partialorder %v4057_v46, 0.0  ;;  %vm2981_vm4 = vcmp.eq.f32.partialorder %v4077_v9, inf }
 0x1d0   :  { %v3116_v55 = vadd.f32 %v3102_v35, %v3009_v3  ;;  %v2971_v34 = vsel %vm2969_vm8, %v2970_v53, %v2968_v43  ;;  %v2978_v15 = vsel %vm2976_vm1, %v2977_v4, %v2975_v20  ;;  %v2982_v8 = vsel %vm2981_vm4, %v4077_v9, %v2980_v31 }
 0x1d1   :  { %vm2983_vm5 = vcmp.eq.f32.partialorder %v4077_v9, 0.0  ;;  %v2984_v57 = vand.u32 2147483648, %v4077_v9  ;;  %v2987_v62 = vmul.f32 %v4166_v19, %v4089_v14  ;;  %vm2988_vm11 = vcmp.eq.f32.partialorder %v4089_v14, inf }
 0x1d2   :  { %3121 = vst.msk [vmem:[%s4323_s3 + $0x10] sm:$0xff] %vm3118_vm9, %v3116_v55  ;;  %vm2990_vm15 = vcmp.eq.f32.partialorder %v4089_v14, 0.0  ;;  %v2991_v46 = vand.u32 2147483648, %v4089_v14  ;;  %v2994_v44 = vmul.f32 %v4178_v12, %v4102_v2  ;;  %vm2995_vm7 = vcmp.eq.f32.partialorder %v4102_v2, inf }
 0x1d3   :  { %v2985_v9 = vsel %vm2983_vm5, %v2984_v57, %v2982_v8  ;;  %v2989_v61 = vsel %vm2988_vm11, %v4089_v14, %v2987_v62  ;;  %vm2997_vm8 = vcmp.eq.f32.partialorder %v4102_v2, 0.0  ;;  %v3001_v19 = vmul.f32 %v3484_v38, %v4124_v23 }
 0x1d4   :  { %v2992_v50 = vsel %vm2990_vm15, %v2991_v46, %v2989_v61  ;;  %v2996_v54 = vsel %vm2995_vm7, %v4102_v2, %v2994_v44  ;;  %v2998_v25 = vand.u32 2147483648, %v4102_v2  ;;  %vm3002_vm13 = vcmp.eq.f32.partialorder %v4124_v23, inf }
 0x1d5   :  { %v3003_v28 = vsel %vm3002_vm13, %v4124_v23, %v3001_v19  ;;  %vm3004_vm1 = vcmp.eq.f32.partialorder %v4124_v23, 0.0  ;;  %v3005_v12 = vand.u32 2147483648, %v4124_v23  ;;  %v3035_v63 = vmul.f32 0.001, %v2957_v18 }
 0x1d6   :  { %v2999_v29 = vsel %vm2997_vm8, %v2998_v25, %v2996_v54  ;;  %v3036_v14 = vmul.f32 0.001, %v2964_v27  ;;  %v3037_v49 = vmul.f32 0.001, %v2971_v34  ;;  %v3038_v24 = vmul.f32 0.001, %v2978_v15 }
 0x1d7   :  { %v3006_v36 = vsel %vm3004_vm1, %v3005_v12, %v3003_v28  ;;  %v3039_v41 = vmul.f32 0.001, %v2985_v9  ;;  %v3040_v58 = vmul.f32 0.001, %v2992_v50  ;;  %v3041_v56 = vmul.f32 0.001, %v2999_v29 }
 0x1d8   :  { %v3103_v32 = vsel %vm3075_vm10, %v3036_v14, %v3035_v63  ;;  %v3042_v47 = vmul.f32 0.001, %v3006_v36  ;;  %v3010_v40 = vsub.f32 0.0, %v88_v52 }
 0x1d9   :  { %v3104_v2 = vsel %vm3077_vm12, %v3037_v49, %v3103_v32 }
 0x1da   :  { %v3105_v33 = vsel %vm3079_vm14, %v3038_v24, %v3104_v2 }
 0x1db   :  { %v3106_v38 = vsel %vm3081_vm0, %v3039_v41, %v3105_v33 }
 0x1dc   :  { %v3107_v23 = vsel %vm3083_vm2, %v3040_v58, %v3106_v38 }
 0x1dd   :  { %v3108_v6 = vsel %vm3085_vm6, %v3041_v56, %v3107_v23 }
 0x1de   :  { %v3109_v21 = vsel %vm3087_vm3, %v3042_v47, %v3108_v6 }
 0x1df   :  { %v3117_v13 = vadd.f32 %v3109_v21, %v3010_v40 }
 0x1e1   :  { %3122 = vst.msk [vmem:[%s4323_s3 + $0x18] sm:$0xff] %vm3118_vm9, %v3117_v13 }

</bundles_post_ra>
